<compile_context>
chip_gen: v6e
topology: v6e:2x2x1
jax: 0.10.0
libtpu: 0.0.40
codegen_flags: <defaults>
</compile_context>

<pallas_src>
import functools

import jax
import jax.numpy as jnp
from jax.experimental import pallas as pl
from jax.experimental.pallas import tpu as pltpu

WEIGHT_BITS = 4            # bit_width = 4 in the reference module
ACT_BITS = 8               # brevitas QuantReLU default act quant is uint8
ACT_MAX = 6.0              # fixed init-time representable max
ACT_QMAX = float(2 ** ACT_BITS - 1)      # 255
ACT_SCALE = ACT_MAX / ACT_QMAX
INV_ACT_SCALE = 1.0 / ACT_SCALE

IN_FEATURES = 28 * 28      # 784
HIDDEN = 512
OUT_FEATURES = 10
LANE = 128
BF16_SUBLANE = 16          # bf16 packs 2 rows per f32 sublane -> 16-row tiles


def _round_up(n, m):
    return (n + m - 1) // m * m


N_PAD = _round_up(OUT_FEATURES, LANE)    # 128 (lane-dense output store)


def _fake_quant_weight(w, bit_width=WEIGHT_BITS):
    """Symmetric, narrow-range, per-tensor int fake-quant (brevitas weight default)."""
    qmax = 2 ** (bit_width - 1) - 1              # 7 for 4-bit narrow range
    scale = jnp.max(jnp.abs(w)) / qmax
    return (jnp.clip(jnp.round(w / scale), -qmax, qmax) * scale).astype(jnp.float32)


def prepare_params(w1, w2, w3):
    """Fake-quant weights, fold the activation scales, transpose, pad, cast bf16.

    Scale folding (per-tensor scale is a linear factor, so this is exact):
        q(h) = min(round(relu(h) / s), 255),  quant_relu(h) = s * q(h)
        logits = s*q( s*q(x @ W1) @ W2 ) @ W3
               =   q(   q(x @ (W1/s)) @ W2 ) @ (s*W3)
    The kernel therefore passes the integer q (<= 255, exact in bf16) between
    layers and needs no per-element scaling at all.
    """
    w1_t = (_fake_quant_weight(w1) * INV_ACT_SCALE).T           # (784, 512)
    w2_t = _fake_quant_weight(w2).T                             # (512, 512)  (s / s cancels)
    w3_t = (_fake_quant_weight(w3) * ACT_SCALE).T               # (512, 10)
    w3_t = jnp.pad(w3_t, ((0, 0), (0, N_PAD - OUT_FEATURES)))   # (512, 128)
    return (w1_t.astype(jnp.bfloat16),
            w2_t.astype(jnp.bfloat16),
            w3_t.astype(jnp.bfloat16))


def _quant_relu_q(h):
    """QuantReLU with the scale folded into the weights: integer level q <= 255.

    ReLU already guarantees >= 0, so only the upper clamp is needed.
    """
    return jnp.minimum(jnp.round(jnp.maximum(h, 0.0)), ACT_QMAX)


def mlp_kernel(x_ref, w1_ref, w2_ref, w3_ref, o_ref):
    # x_ref: (TB, 784) f32; w1: (784, 512), w2: (512, 512), w3: (512, 128) bf16.
    x = x_ref[...].astype(jnp.bfloat16)                  # cast fused into the kernel
    h1 = jnp.dot(x, w1_ref[...], preferred_element_type=jnp.float32)
    q1 = _quant_relu_q(h1).astype(jnp.bfloat16)          # integer-valued -> exact in bf16
    h2 = jnp.dot(q1, w2_ref[...], preferred_element_type=jnp.float32)
    q2 = _quant_relu_q(h2).astype(jnp.bfloat16)
    logits = jnp.dot(q2, w3_ref[...], preferred_element_type=jnp.float32)
    o_ref[...] = logits.astype(o_ref.dtype)              # bf16 store (lane-dense 128 cols)


@functools.partial(jax.jit, static_argnames=("block_b",))
def quant_neural_network(x, w1_t, w2_t, w3_t, *, block_b=1024):
    """x: (B, 1, 28, 28) float32 (NCHW).  Returns logits (B, 10) float32."""
    B = x.shape[0]
    block_b = _round_up(block_b, BF16_SUBLANE)

    # nn.Flatten (free reshape).  x stays f32 in HBM; bf16 cast happens inside
    # the kernel so the input is read exactly once.
    x_flat = x.reshape(B, IN_FEATURES)

    # Batch tile: multiple of 16 (bf16 sublane packing).  When the whole batch
    # fits one tile but B >= 32, split into >= 2 grid steps so the "parallel"
    # axis can shard across v7x's two TensorCores.
    b16 = _round_up(B, BF16_SUBLANE)
    if b16 > block_b:
        tb = block_b
    elif b16 >= 2 * BF16_SUBLANE:
        tb = _round_up(b16 // 2, BF16_SUBLANE)
    else:
        tb = b16
    b_pad = _round_up(B, tb)
    if b_pad != B:
        x_flat = jnp.pad(x_flat, ((0, b_pad - B), (0, 0)))   # zero rows, sliced off below

    out = pl.pallas_call(
        mlp_kernel,
        out_shape=jax.ShapeDtypeStruct((b_pad, N_PAD), jnp.bfloat16),
        grid=(b_pad // tb,),
        in_specs=[
            # x tiles stream over the batch axis; full-K (784) block is legal
            # because it equals the full array dim.
            pl.BlockSpec((tb, IN_FEATURES), lambda i: (i, 0)),
            # Weights: constant block index -> DMA'd once, resident in VMEM.
            pl.BlockSpec(w1_t.shape, lambda i: (0, 0)),
            pl.BlockSpec(w2_t.shape, lambda i: (0, 0)),
            pl.BlockSpec(w3_t.shape, lambda i: (0, 0)),
        ],
        out_specs=pl.BlockSpec((tb, N_PAD), lambda i: (i, 0)),
        compiler_params=pltpu.CompilerParams(
            # Batch axis is independent -> parallel (shards across v7x's 2 TCs).
            dimension_semantics=("parallel",),
            # ~15 MiB actually used at tb=1024; 32 MiB is safe on all of
            # v5e/v6e (128 MiB) and v7x (64 MiB).  Raise along with block_b
            # for very large batches on v5e/v6e.
            vmem_limit_bytes=32 << 20,
        ),
    )(x_flat, w1_t, w2_t, w3_t)

    return out[:B, :OUT_FEATURES].astype(jnp.float32)


def _init_linear_weight(key, out_features, in_features):
    """PyTorch nn.Linear default init: U(-1/sqrt(fan_in), 1/sqrt(fan_in)), (out, in)."""
    bound = 1.0 / jnp.sqrt(jnp.float32(in_features))
    return jax.random.uniform(
        key, (out_features, in_features), dtype=jnp.float32, minval=-bound, maxval=bound
    )


def _reference_forward(x, w1, w2, w3):
    """Pure-JAX f32 reference with the original (un-folded) fake-quant semantics."""
    def quant_relu(h):
        h = jnp.maximum(h, 0.0)
        return jnp.clip(jnp.round(h * INV_ACT_SCALE), 0.0, ACT_QMAX) * ACT_SCALE

    hp = jax.lax.Precision.HIGHEST
    xf = x.reshape(x.shape[0], -1)
    h1 = quant_relu(jnp.dot(xf, _fake_quant_weight(w1).T, precision=hp))
    h2 = quant_relu(jnp.dot(h1, _fake_quant_weight(w2).T, precision=hp))
    return jnp.dot(h2, _fake_quant_weight(w3).T, precision=hp)


if __name__ == "__main__":
    key = jax.random.PRNGKey(0)
    kx, k1, k2, k3 = jax.random.split(key, 4)

    # Deterministic synthetic parameters (PyTorch (out, in) convention).
    w1 = _init_linear_weight(k1, HIDDEN, IN_FEATURES)
    w2 = _init_linear_weight(k2, HIDDEN, HIDDEN)
    w3 = _init_linear_weight(k3, OUT_FEATURES, HIDDEN)

    # One-time parameter transform: fake-quant + scale folding + pad + bf16.
    w1_t, w2_t, w3_t = prepare_params(w1, w2, w3)

    # Small MNIST-like input batch, NCHW.
    x = jax.random.uniform(kx, (2, 1, 28, 28), dtype=jnp.float32)

    logits = quant_neural_network(x, w1_t, w2_t, w3_t)
    jax.block_until_ready(logits)

    assert logits.shape == (2, OUT_FEATURES), logits.shape
    assert bool(jnp.all(jnp.isfinite(logits)))

    # Loose numerical check against the f32 reference (bf16 weight rounding only;
    # the folded integer activations are exact).
    ref = _reference_forward(x, w1, w2, w3)
    max_err = float(jnp.max(jnp.abs(logits - ref)))
    assert max_err < 0.1, f"max abs error vs reference: {max_err}"

    print("KERNEL_OK")
</pallas_src>

<mosaic_0001>
module attributes {stable_mosaic.version = 11 : i64} {
  func.func @mlp_kernel(%arg0: i32, %arg1: memref<16x784xf32, #tpu.memory_space<vmem>>, %arg2: memref<784x512xbf16, #tpu.memory_space<vmem>>, %arg3: memref<512x512xbf16, #tpu.memory_space<vmem>>, %arg4: memref<512x128xbf16, #tpu.memory_space<vmem>>, %arg5: memref<16x128xbf16, #tpu.memory_space<vmem>>) attributes {dimension_semantics = [#tpu.dimension_semantics<parallel>], iteration_bounds = array<i64: 1>, scalar_prefetch = 0 : i64, scratch_operands = 0 : i64, tpu.core_type = #tpu.core_type<tc>, window_params = [{transform_indices = @transform_0, window_bounds = array<i64: 16, 784>}, {pipeline_mode = #tpu.pipeline_mode<synchronous>, transform_indices = @transform_1, window_bounds = array<i64: 784, 512>}, {pipeline_mode = #tpu.pipeline_mode<synchronous>, transform_indices = @transform_2, window_bounds = array<i64: 512, 512>}, {pipeline_mode = #tpu.pipeline_mode<synchronous>, transform_indices = @transform_3, window_bounds = array<i64: 512, 128>}, {transform_indices = @transform_4, window_bounds = array<i64: 16, 128>}]} {
    %c0 = arith.constant 0 : index
    %c0_0 = arith.constant 0 : index
    %0 = vector.load %arg1[%c0, %c0_0] : memref<16x784xf32, #tpu.memory_space<vmem>>, vector<16x784xf32>
    %1 = arith.truncf %0 : vector<16x784xf32> to vector<16x784xbf16>
    %c0_1 = arith.constant 0 : index
    %c0_2 = arith.constant 0 : index
    %2 = vector.load %arg2[%c0_1, %c0_2] : memref<784x512xbf16, #tpu.memory_space<vmem>>, vector<784x512xbf16>
    %cst = arith.constant dense<0.000000e+00> : vector<16x512xf32>
    %3 = tpu.matmul %1, %2, %cst {dimension_numbers = #tpu.dot_dimension_numbers<[1], [0], [0], [1], [0, 0, 1, 1], [], []>} : vector<16x784xbf16>, vector<784x512xbf16>, vector<16x512xf32> -> vector<16x512xf32>
    %cst_3 = arith.constant 0.000000e+00 : f32
    %4 = vector.broadcast %cst_3 : f32 to vector<16x512xf32>
    %5 = arith.maximumf %3, %4 : vector<16x512xf32>
    %6 = math.roundeven %5 : vector<16x512xf32>
    %cst_4 = arith.constant 2.550000e+02 : f32
    %7 = vector.broadcast %cst_4 : f32 to vector<16x512xf32>
    %8 = arith.minimumf %6, %7 : vector<16x512xf32>
    %9 = arith.truncf %8 : vector<16x512xf32> to vector<16x512xbf16>
    %c0_5 = arith.constant 0 : index
    %c0_6 = arith.constant 0 : index
    %10 = vector.load %arg3[%c0_5, %c0_6] : memref<512x512xbf16, #tpu.memory_space<vmem>>, vector<512x512xbf16>
    %cst_7 = arith.constant dense<0.000000e+00> : vector<16x512xf32>
    %11 = tpu.matmul %9, %10, %cst_7 {dimension_numbers = #tpu.dot_dimension_numbers<[1], [0], [0], [1], [0, 0, 1, 1], [], []>} : vector<16x512xbf16>, vector<512x512xbf16>, vector<16x512xf32> -> vector<16x512xf32>
    %cst_8 = arith.constant 0.000000e+00 : f32
    %12 = vector.broadcast %cst_8 : f32 to vector<16x512xf32>
    %13 = arith.maximumf %11, %12 : vector<16x512xf32>
    %14 = math.roundeven %13 : vector<16x512xf32>
    %cst_9 = arith.constant 2.550000e+02 : f32
    %15 = vector.broadcast %cst_9 : f32 to vector<16x512xf32>
    %16 = arith.minimumf %14, %15 : vector<16x512xf32>
    %17 = arith.truncf %16 : vector<16x512xf32> to vector<16x512xbf16>
    %c0_10 = arith.constant 0 : index
    %c0_11 = arith.constant 0 : index
    %18 = vector.load %arg4[%c0_10, %c0_11] : memref<512x128xbf16, #tpu.memory_space<vmem>>, vector<512x128xbf16>
    %cst_12 = arith.constant dense<0.000000e+00> : vector<16x128xf32>
    %19 = tpu.matmul %17, %18, %cst_12 {dimension_numbers = #tpu.dot_dimension_numbers<[1], [0], [0], [1], [0, 0, 1, 1], [], []>} : vector<16x512xbf16>, vector<512x128xbf16>, vector<16x128xf32> -> vector<16x128xf32>
    %20 = arith.truncf %19 : vector<16x128xf32> to vector<16x128xbf16>
    %c0_13 = arith.constant 0 : index
    %c0_14 = arith.constant 0 : index
    %21 = vector.load %arg5[%c0_13, %c0_14] : memref<16x128xbf16, #tpu.memory_space<vmem>>, vector<16x128xbf16>
    tpu.vector_store %arg5[%c0_13, %c0_14], %20 {strides = array<i32>} : memref<16x128xbf16, #tpu.memory_space<vmem>>, vector<16x128xbf16>,
    return
  }
  func.func @transform_0(%arg0: i32) -> (i32, i32) {
    %c0_i32 = arith.constant 0 : i32
    %c0_i32_0 = arith.constant 0 : i32
    return %arg0, %c0_i32 : i32, i32
  }
  func.func @transform_1(%arg0: i32) -> (i32, i32) {
    %c0_i32 = arith.constant 0 : i32
    %c0_i32_0 = arith.constant 0 : i32
    %c0_i32_1 = arith.constant 0 : i32
    return %c0_i32, %c0_i32_0 : i32, i32
  }
  func.func @transform_2(%arg0: i32) -> (i32, i32) {
    %c0_i32 = arith.constant 0 : i32
    %c0_i32_0 = arith.constant 0 : i32
    %c0_i32_1 = arith.constant 0 : i32
    return %c0_i32, %c0_i32_0 : i32, i32
  }
  func.func @transform_3(%arg0: i32) -> (i32, i32) {
    %c0_i32 = arith.constant 0 : i32
    %c0_i32_0 = arith.constant 0 : i32
    %c0_i32_1 = arith.constant 0 : i32
    return %c0_i32, %c0_i32_0 : i32, i32
  }
  func.func @transform_4(%arg0: i32) -> (i32, i32) {
    %c0_i32 = arith.constant 0 : i32
    %c0_i32_0 = arith.constant 0 : i32
    return %arg0, %c0_i32 : i32, i32
  }
}

</mosaic_0001>

<bundles_post_ra>
// kernel: quant_neural_network.1
= control target key start
LH: loop header
LB: loop body
LE: loop exit
PB: predicated region body
PF: predicated region fallthrough
CT: control target
= control target key end

     0   :  { %9 = vsyncpa [#allocation3], 0  ;;  %s4264_s0 = inlined_call_operand.vmem [shape: f32[16,784], index: 0, kind: input, shape index: {}]   ;;  %s4265_s1 = inlined_call_operand.hbm [shape: bf16[784,512], index: 1, kind: input, shape index: {}]   ;;  %s4266_s2 = inlined_call_operand.hbm [shape: bf16[512,512], index: 2, kind: input, shape index: {}]   ;;  %s4267_s3 = inlined_call_operand.vmem [shape: bf16[512,128], index: 3, kind: input, shape index: {}]   ;;  %s4268_s4 = inlined_call_operand.vmem [shape: bf16[16,128], index: 4, kind: output, shape index: {}]  }
   0x1   :  { %10 = vsyncpa [#allocation5], 0  ;;  %s4047_s15 = smov [#allocation2]  }
   0x2   :  { %s18_s16 = sshll.u32 %s4047_s15, 4  ;;  %s19_s16 = int_to_ptr.vmem [resolvable:$true] %s18_s16 }
   0x3   :  { %s4011_s17 = scalar_lea.vmem %s19_s16, 25088  ;;  %p4016_p1 = scmp.lt.s32.totalorder %s19_s16, %s19_s16 }
   0x4   :  { %p4012_p0 = scmp.ne.s32.totalorder %s19_s16, %s4011_s17  ;;  %p4017_p2 = scmp.lt.s32.totalorder %s4011_s17, %s4011_s17 }
   0x6   :  { %p4018_p3 = por %p4017_p2, %p4016_p1 }
   0x8   :  { %p4019_p4 = pnand %p4018_p3, %p4012_p0 }
   0xa   :  { %4022 = shalt.err (!%p4019_p4)
}
   0xb   :  { %s4048_s18 = smov 256   ;;  %s4049_s19 = smov 16  }
   0xc   :  { %24 = dma.hbm_to_vmem [thread:$0]  %s4265_s1, 25088, %s19_s16, [#allocation3], %s4048_s18, %s4048_s18, %s4049_s19  }
   0xd   :  { %s4050_s22 = smov [#allocation4]  }
   0xe   :  { %s30_s23 = sshll.u32 %s4050_s22, 4  ;;  %s31_s23 = int_to_ptr.vmem [resolvable:$true] %s30_s23 }
   0xf   :  { %s4031_s24 = scalar_lea.vmem %s31_s23, 16384  ;;  %p4036_p6 = scmp.lt.s32.totalorder %s31_s23, %s31_s23 }
  0x10   :  { %p4032_p5 = scmp.ne.s32.totalorder %s31_s23, %s4031_s24  ;;  %p4037_p7 = scmp.lt.s32.totalorder %s4031_s24, %s4031_s24 }
  0x12   :  { %p4038_p8 = por %p4037_p7, %p4036_p6 }
  0x14   :  { %p4039_p9 = pnand %p4038_p8, %p4032_p5 }
  0x16   :  { %4042 = shalt.err (!%p4039_p9)
}
  0x17   :  { %36 = dma.hbm_to_vmem [thread:$0]  %s4266_s2, 16384, %s31_s23, [#allocation5], %s4048_s18, %s4048_s18, %s4049_s19  }
  0x18   :  { %4043 = dma.done.wait [#allocation3], 25088  }
  0x19   :  { %4044 = vsyncadd [#allocation3], 4294942208 }
  0x1a   :  { %4045 = dma.done.wait [#allocation5], 16384  }
  0x1b   :  { %4046 = vsyncadd [#allocation5], 4294950912  ;;  %v3485_v0 = vld [vmem:[#allocation2 + $0xe4] ss:$16 sps:$4 sm:$0xff]   ;;  %v3489_v2 = vld [vmem:[#allocation2 + $0xe0] ss:$16 sps:$4 sm:$0xff]  }
  0x1c   :  { %v3487_v1 = vld [vmem:[#allocation2 + $0x2e4] ss:$16 sps:$4 sm:$0xff]   ;;  %1247 = vmatprep.subr.bf16.mxu0 %v3485_v0  ;;  %v3490_v3 = vld [vmem:[#allocation2 + $0x2e0] ss:$16 sps:$4 sm:$0xff]   ;;  %v47_v46 = vld [vmem:[%s4264_s0 + $0x8] sm:$0xff]  ;;  %vm1243_vm0 = vcmask 130048  }
  0x1d   :  { %1290 = vmatprep.subr.bf16.mxu1 %v3487_v1  ;;  %v3491_v4 = vld [vmem:[#allocation2 + $0xc4] ss:$16 sps:$4 sm:$0xff]   ;;  %1248 = vmatpush1.bf16.msra.mxu0 %v3489_v2  ;;  %v3495_v6 = vld [vmem:[#allocation2 + $0xc0] ss:$16 sps:$4 sm:$0xff]   ;;  %v49_v48 = vld [vmem:[%s4264_s0 + $0x18] sm:$0xff] }
  0x1e   :  { %1291 = vmatpush1.bf16.msra.mxu1 %v3490_v3  ;;  %v3493_v5 = vld [vmem:[#allocation2 + $0x2c4] ss:$16 sps:$4 sm:$0xff]   ;;  %1249 = vmatprep.subr.bf16.mxu0 %v3491_v4  ;;  %v3496_v7 = vld [vmem:[#allocation2 + $0x2c0] ss:$16 sps:$4 sm:$0xff]  }
  0x1f   :  { %1292 = vmatprep.subr.bf16.mxu1 %v3493_v5  ;;  %v3497_v8 = vld [vmem:[#allocation2 + $0xa4] ss:$16 sps:$4 sm:$0xff]   ;;  %v3501_v10 = vld [vmem:[#allocation2 + $0xa0] ss:$16 sps:$4 sm:$0xff]  }
  0x20   :  { %v3499_v9 = vld [vmem:[#allocation2 + $0x2a4] ss:$16 sps:$4 sm:$0xff]   ;;  %v3502_v11 = vld [vmem:[#allocation2 + $0x2a0] ss:$16 sps:$4 sm:$0xff]  }
  0x21   :  { %1250 = vmatpush1.bf16.msra.mxu0 %v3495_v6  ;;  %v3503_v12 = vld [vmem:[#allocation2 + $0x84] ss:$16 sps:$4 sm:$0xff]   ;;  %v3507_v14 = vld [vmem:[#allocation2 + $0x80] ss:$16 sps:$4 sm:$0xff]  }
  0x22   :  { %1293 = vmatpush1.bf16.msra.mxu1 %v3496_v7  ;;  %1251 = vmatprep.subr.bf16.mxu0 %v3497_v8  ;;  %v3505_v13 = vld [vmem:[#allocation2 + $0x284] ss:$16 sps:$4 sm:$0xff]   ;;  %v3508_v15 = vld [vmem:[#allocation2 + $0x280] ss:$16 sps:$4 sm:$0xff]   ;;  %v53_v7 = vld [vmem:[%s4264_s0 + $0x38] sm:$0xff] }
  0x23   :  { %1294 = vmatprep.subr.bf16.mxu1 %v3499_v9  ;;  %v3509_v16 = vld [vmem:[#allocation2 + $0x64] ss:$16 sps:$4 sm:$0xff]   ;;  %v3513_v18 = vld [vmem:[#allocation2 + $0x60] ss:$16 sps:$4 sm:$0xff]   ;;  %v55_v9 = vld [vmem:[%s4264_s0 + $0x48] sm:$0xff] }
  0x24   :  { %v3511_v17 = vld [vmem:[#allocation2 + $0x264] ss:$16 sps:$4 sm:$0xff]   ;;  %v3514_v19 = vld [vmem:[#allocation2 + $0x260] ss:$16 sps:$4 sm:$0xff]  }
  0x25   :  { %1252 = vmatpush1.bf16.msra.mxu0 %v3501_v10  ;;  %v3515_v20 = vld [vmem:[#allocation2 + $0x44] ss:$16 sps:$4 sm:$0xff]   ;;  %v3519_v22 = vld [vmem:[#allocation2 + $0x40] ss:$16 sps:$4 sm:$0xff]  }
  0x26   :  { %1295 = vmatpush1.bf16.msra.mxu1 %v3502_v11  ;;  %1253 = vmatprep.subr.bf16.mxu0 %v3503_v12  ;;  %v3517_v21 = vld [vmem:[#allocation2 + $0x244] ss:$16 sps:$4 sm:$0xff]   ;;  %v3520_v23 = vld [vmem:[#allocation2 + $0x240] ss:$16 sps:$4 sm:$0xff]  }
  0x27   :  { %1296 = vmatprep.subr.bf16.mxu1 %v3505_v13  ;;  %v3521_v24 = vld [vmem:[#allocation2 + $0x24] ss:$16 sps:$4 sm:$0xff]   ;;  %v3525_v26 = vld [vmem:[#allocation2 + $0x20] ss:$16 sps:$4 sm:$0xff]  }
  0x28   :  { %v3523_v25 = vld [vmem:[#allocation2 + $0x224] ss:$16 sps:$4 sm:$0xff]   ;;  %v3526_v27 = vld [vmem:[#allocation2 + $0x220] ss:$16 sps:$4 sm:$0xff]  }
  0x29   :  { %1254 = vmatpush1.bf16.msra.mxu0 %v3507_v14  ;;  %v3527_v28 = vld [vmem:[#allocation2 + $0x4] ss:$16 sps:$4 sm:$0xff]   ;;  %v3531_v30 = vld [vmem:[#allocation2] ss:$16 sps:$4 sm:$0xff]  }
  0x2a   :  { %1297 = vmatpush1.bf16.msra.mxu1 %v3508_v15  ;;  %1255 = vmatprep.subr.bf16.mxu0 %v3509_v16  ;;  %v3529_v29 = vld [vmem:[#allocation2 + $0x204] ss:$16 sps:$4 sm:$0xff]   ;;  %v3532_v31 = vld [vmem:[#allocation2 + $0x200] ss:$16 sps:$4 sm:$0xff]  }
  0x2b   :  { %1298 = vmatprep.subr.bf16.mxu1 %v3511_v17  ;;  %v3533_v32 = vld [vmem:[#allocation2 + $0x1e4] ss:$16 sps:$4 sm:$0xff]   ;;  %v3537_v34 = vld [vmem:[#allocation2 + $0x1e0] ss:$16 sps:$4 sm:$0xff]   ;;  %v3592_v17 = vld [vmem:[#allocation2 + $0xec] ss:$16 sps:$4 sm:$0xff]  }
  0x2c   :  { %v3535_v33 = vld [vmem:[#allocation2 + $0x3e4] ss:$16 sps:$4 sm:$0xff]   ;;  %v3538_v35 = vld [vmem:[#allocation2 + $0x3e0] ss:$16 sps:$4 sm:$0xff]  }
  0x2d   :  { %1256 = vmatpush1.bf16.msra.mxu0 %v3513_v18  ;;  %v3539_v36 = vld [vmem:[#allocation2 + $0x1c4] ss:$16 sps:$4 sm:$0xff]   ;;  %v3543_v38 = vld [vmem:[#allocation2 + $0x1c0] ss:$16 sps:$4 sm:$0xff]  }
  0x2e   :  { %1299 = vmatpush1.bf16.msra.mxu1 %v3514_v19  ;;  %1257 = vmatprep.subr.bf16.mxu0 %v3515_v20  ;;  %v3541_v37 = vld [vmem:[#allocation2 + $0x3c4] ss:$16 sps:$4 sm:$0xff]   ;;  %v3544_v39 = vld [vmem:[#allocation2 + $0x3c0] ss:$16 sps:$4 sm:$0xff]   ;;  %v59_v20 = vld [vmem:[%s4264_s0 + $0x68] sm:$0xff] }
  0x2f   :  { %1300 = vmatprep.subr.bf16.mxu1 %v3517_v21  ;;  %v3545_v40 = vld [vmem:[#allocation2 + $0x1a4] ss:$16 sps:$4 sm:$0xff]   ;;  %v3549_v42 = vld [vmem:[#allocation2 + $0x1a0] ss:$16 sps:$4 sm:$0xff]   ;;  %v4051_v21 = vmov 0  }
  0x30   :  { %v3547_v41 = vld [vmem:[#allocation2 + $0x3a4] ss:$16 sps:$4 sm:$0xff]   ;;  %v3550_v43 = vld [vmem:[#allocation2 + $0x3a0] ss:$16 sps:$4 sm:$0xff]  }
  0x31   :  { %1258 = vmatpush1.bf16.msra.mxu0 %v3519_v22  ;;  %v3551_v44 = vld [vmem:[#allocation2 + $0x184] ss:$16 sps:$4 sm:$0xff]   ;;  %v3555_v50 = vld [vmem:[#allocation2 + $0x180] ss:$16 sps:$4 sm:$0xff]  }
  0x32   :  { %1301 = vmatpush1.bf16.msra.mxu1 %v3520_v23  ;;  %1259 = vmatprep.subr.bf16.mxu0 %v3521_v24  ;;  %v3553_v45 = vld [vmem:[#allocation2 + $0x384] ss:$16 sps:$4 sm:$0xff]   ;;  %v3556_v51 = vld [vmem:[#allocation2 + $0x380] ss:$16 sps:$4 sm:$0xff]   ;;  %v3590_v24 = vld [vmem:[#allocation2 + $0xe8] ss:$16 sps:$4 sm:$0xff]  }
  0x33   :  { %1302 = vmatprep.subr.bf16.mxu1 %v3523_v25  ;;  %v54_v47 = vld [vmem:[%s4264_s0 + $0x40] sm:$0xff]  ;;  %v56_v49 = vld [vmem:[%s4264_s0 + $0x50] sm:$0xff] }
  0x34   :  { %v3557_v52 = vld [vmem:[#allocation2 + $0x164] ss:$16 sps:$4 sm:$0xff]   ;;  %v4095_v53 = vpack.c.bf16 %v54_v47, %v47_v46  ;;  %v4097_v54 = vpack.c.bf16 %v56_v49, %v49_v48  ;;  %v3561_v56 = vld [vmem:[#allocation2 + $0x160] ss:$16 sps:$4 sm:$0xff]   ;;  %v3620_v47 = vld [vmem:[#allocation2 + $0x48] ss:$16 sps:$4 sm:$0xff]  }
  0x35   :  { %1260 = vmatpush1.bf16.msra.mxu0 %v3525_v26  ;;  %v3559_v55 = vld [vmem:[#allocation2 + $0x364] ss:$16 sps:$4 sm:$0xff]   ;;  %v3562_v57 = vld [vmem:[#allocation2 + $0x360] ss:$16 sps:$4 sm:$0xff]   ;;  %v3598_v26 = vld [vmem:[#allocation2 + $0xcc] ss:$16 sps:$4 sm:$0xff]  }
  0x36   :  { %1303 = vmatpush1.bf16.msra.mxu1 %v3526_v27  ;;  %1261 = vmatprep.subr.bf16.mxu0 %v3527_v28  ;;  %v3563_v58 = vld [vmem:[#allocation2 + $0x144] ss:$16 sps:$4 sm:$0xff]   ;;  %v3567_v60 = vld [vmem:[#allocation2 + $0x140] ss:$16 sps:$4 sm:$0xff]   ;;  %v3596_v28 = vld [vmem:[#allocation2 + $0xc8] ss:$16 sps:$4 sm:$0xff]  }
  0x37   :  { %1304 = vmatprep.subr.bf16.mxu1 %v3529_v29  ;;  %1279 = vmatprep.mubr.bf16.mxu0 %v4095_v53  ;;  %v3565_v59 = vld [vmem:[#allocation2 + $0x344] ss:$16 sps:$4 sm:$0xff]   ;;  %v3568_v61 = vld [vmem:[#allocation2 + $0x340] ss:$16 sps:$4 sm:$0xff]   ;;  %v3628_v49 = vld [vmem:[#allocation2 + $0x2c] ss:$16 sps:$4 sm:$0xff]  }
  0x38   :  { %1322 = vmatprep.mubr.bf16.mxu1 %v4097_v54  ;;  %v3569_v62 = vld [vmem:[#allocation2 + $0x124] ss:$16 sps:$4 sm:$0xff]   ;;  %v3573_v0 = vld [vmem:[#allocation2 + $0x120] ss:$16 sps:$4 sm:$0xff]  }
  0x39   :  { %1262 = vmatpush1.bf16.msra.mxu0 %v3531_v30  ;;  %v3571_v63 = vld [vmem:[#allocation2 + $0x324] ss:$16 sps:$4 sm:$0xff]   ;;  %v3574_v1 = vld [vmem:[#allocation2 + $0x320] ss:$16 sps:$4 sm:$0xff]   ;;  %v3604_v30 = vld [vmem:[#allocation2 + $0xac] ss:$16 sps:$4 sm:$0xff]  }
  0x3a   :  { %1305 = vmatpush1.bf16.msra.mxu1 %v3532_v31  ;;  %1263 = vmatprep.subr.bf16.mxu0 %v3533_v32  ;;  %v3575_v2 = vld [vmem:[#allocation2 + $0x104] ss:$16 sps:$4 sm:$0xff]   ;;  %v3579_v4 = vld [vmem:[#allocation2 + $0x100] ss:$16 sps:$4 sm:$0xff]   ;;  %v3602_v32 = vld [vmem:[#allocation2 + $0xa8] ss:$16 sps:$4 sm:$0xff]  }
  0x3b   :  { %1306 = vmatprep.subr.bf16.mxu1 %v3535_v33  ;;  %v3577_v3 = vld [vmem:[#allocation2 + $0x304] ss:$16 sps:$4 sm:$0xff]   ;;  %v3580_v5 = vld [vmem:[#allocation2 + $0x300] ss:$16 sps:$4 sm:$0xff]  }
  0x3c   :  { %v46_v6 = vld [vmem:[%s4264_s0] sm:$0xff]  ;;  %v48_v8 = vld [vmem:[%s4264_s0 + $0x10] sm:$0xff] }
  0x3d   :  { %1264 = vmatpush2.bf16.msra.mxu0 %v3537_v34  ;;  %v3583_v10 = vld [vmem:[#allocation2 + $0x4e4] ss:$16 sps:$4 sm:$0xff]   ;;  %v4113_v12 = vpack.c.bf16 %v53_v7, %v46_v6  ;;  %v4115_v13 = vpack.c.bf16 %v55_v9, %v48_v8  ;;  %v3581_v14 = vld [vmem:[#allocation2 + $0x4e0] ss:$16 sps:$4 sm:$0xff]   ;;  %v3610_v34 = vld [vmem:[#allocation2 + $0x8c] ss:$16 sps:$4 sm:$0xff]  }
  0x3e   :  { %1307 = vmatpush2.bf16.msra.mxu1 %v3538_v35  ;;  %1265 = vmatprep.subr.bf16.mxu0 %v3539_v36  ;;  %v3586_v11 = vld [vmem:[#allocation2 + $0x604] ss:$16 sps:$4 sm:$0xff]   ;;  %v3584_v15 = vld [vmem:[#allocation2 + $0x600] ss:$16 sps:$4 sm:$0xff]   ;;  %v3608_v36 = vld [vmem:[#allocation2 + $0x88] ss:$16 sps:$4 sm:$0xff]  }
  0x3f   :  { %1308 = vmatprep.subr.bf16.mxu1 %v3541_v37  ;;  %v3589_v16 = vld [vmem:[#allocation2 + $0x4c4] ss:$16 sps:$4 sm:$0xff]   ;;  %v3587_v18 = vld [vmem:[#allocation2 + $0x4c0] ss:$16 sps:$4 sm:$0xff]   ;;  %v3658_v6 = vld [vmem:[#allocation2 + $0x18c] ss:$16 sps:$4 sm:$0xff]  }
  0x40   :  { %v52_v19 = vld [vmem:[%s4264_s0 + $0x30] sm:$0xff]  ;;  %v3656_v8 = vld [vmem:[#allocation2 + $0x188] ss:$16 sps:$4 sm:$0xff]  }
  0x41   :  { %1266 = vmatpush2.bf16.msra.mxu0 %v3543_v38  ;;  %v3595_v22 = vld [vmem:[#allocation2 + $0x4a4] ss:$16 sps:$4 sm:$0xff]   ;;  %v4126_v23 = vpack.c.bf16 %v59_v20, %v52_v19  ;;  %v3593_v25 = vld [vmem:[#allocation2 + $0x4a0] ss:$16 sps:$4 sm:$0xff]   ;;  %v3616_v38 = vld [vmem:[#allocation2 + $0x6c] ss:$16 sps:$4 sm:$0xff]  }
  0x42   :  { %1309 = vmatpush2.bf16.msra.mxu1 %v3544_v39  ;;  %1267 = vmatprep.subr.bf16.mxu0 %v3545_v40  ;;  %v3601_v27 = vld [vmem:[#allocation2 + $0x484] ss:$16 sps:$4 sm:$0xff]   ;;  %v3599_v29 = vld [vmem:[#allocation2 + $0x480] ss:$16 sps:$4 sm:$0xff]   ;;  %v3614_v40 = vld [vmem:[#allocation2 + $0x68] ss:$16 sps:$4 sm:$0xff]  }
  0x43   :  { %1310 = vmatprep.subr.bf16.mxu1 %v3547_v41  ;;  %v3607_v31 = vld [vmem:[#allocation2 + $0x464] ss:$16 sps:$4 sm:$0xff]   ;;  %v3605_v33 = vld [vmem:[#allocation2 + $0x460] ss:$16 sps:$4 sm:$0xff]   ;;  %v51_v41 = vld [vmem:[%s4264_s0 + $0x28] sm:$0xff] }
  0x44   :  { %v3613_v35 = vld [vmem:[#allocation2 + $0x444] ss:$16 sps:$4 sm:$0xff]   ;;  %v3611_v37 = vld [vmem:[#allocation2 + $0x440] ss:$16 sps:$4 sm:$0xff]  }
  0x45   :  { %1268 = vmatpush2.bf16.msra.mxu0 %v3549_v42  ;;  %v3619_v39 = vld [vmem:[#allocation2 + $0x424] ss:$16 sps:$4 sm:$0xff]   ;;  %v3623_v48 = vld [vmem:[#allocation2 + $0x400] ss:$16 sps:$4 sm:$0xff]  }
  0x46   :  { %1311 = vmatpush2.bf16.msra.mxu1 %v3550_v43  ;;  %1269 = vmatprep.subr.bf16.mxu0 %v3551_v44  ;;  %v58_v42 = vld [vmem:[%s4264_s0 + $0x60] sm:$0xff] }
  0x47   :  { %1312 = vmatprep.subr.bf16.mxu1 %v3553_v45  ;;  %v3617_v43 = vld [vmem:[#allocation2 + $0x420] ss:$16 sps:$4 sm:$0xff]   ;;  %v4137_v44 = vpack.c.bf16 %v58_v42, %v51_v41  ;;  %v3622_v45 = vld [vmem:[#allocation2 + $0x4c] ss:$16 sps:$4 sm:$0xff]   ;;  %v3625_v46 = vld [vmem:[#allocation2 + $0x404] ss:$16 sps:$4 sm:$0xff]  }
  0x48   :  { %v3661_v7 = vld [vmem:[#allocation2 + $0x544] ss:$16 sps:$4 sm:$0xff]   ;;  %v3659_v9 = vld [vmem:[#allocation2 + $0x540] ss:$16 sps:$4 sm:$0xff]   ;;  %v3700_v41 = vld [vmem:[#allocation2 + $0x4ac] ss:$16 sps:$4 sm:$0xff]  }
  0x49   :  { %1270 = vmatpush2.bf16.msra.mxu0 %v3555_v50  ;;  %v3631_v50 = vld [vmem:[#allocation2 + $0x5e4] ss:$16 sps:$4 sm:$0xff]   ;;  %v3671_v19 = vld [vmem:[#allocation2 + $0x500] ss:$16 sps:$4 sm:$0xff]   ;;  %v3703_v42 = vld [vmem:[#allocation2 + $0x26c] ss:$16 sps:$4 sm:$0xff]  }
  0x4a   :  { %1313 = vmatpush2.bf16.msra.mxu1 %v3556_v51  ;;  %1271 = vmatprep.subr.bf16.mxu0 %v3557_v52  ;;  %v3626_v51 = vld [vmem:[#allocation2 + $0x28] ss:$16 sps:$4 sm:$0xff]   ;;  %v3629_v52 = vld [vmem:[#allocation2 + $0x5e0] ss:$16 sps:$4 sm:$0xff]  }
  0x4b   :  { %1314 = vmatprep.subr.bf16.mxu1 %v3559_v55  ;;  %v3637_v55 = vld [vmem:[#allocation2 + $0x5c4] ss:$16 sps:$4 sm:$0xff]  }
  0x4c   :  { %v50_v20 = vld [vmem:[%s4264_s0 + $0x20] sm:$0xff] }
  0x4d   :  { %1272 = vmatpush2.bf16.msra.mxu0 %v3561_v56  ;;  %v3632_v56 = vld [vmem:[#allocation2 + $0x8] ss:$16 sps:$4 sm:$0xff]  }
  0x4e   :  { %1315 = vmatpush2.bf16.msra.mxu1 %v3562_v57  ;;  %1273 = vmatprep.subr.bf16.mxu0 %v3563_v58  ;;  %v3635_v57 = vld [vmem:[#allocation2 + $0x5c0] ss:$16 sps:$4 sm:$0xff]   ;;  %v3640_v58 = vld [vmem:[#allocation2 + $0x1ec] ss:$16 sps:$4 sm:$0xff]  }
  0x4f   :  { %1316 = vmatprep.subr.bf16.mxu1 %v3565_v59  ;;  %v3643_v59 = vld [vmem:[#allocation2 + $0x5a4] ss:$16 sps:$4 sm:$0xff]  }
  0x51   :  { %1274 = vmatpush2.bf16.msra.mxu0 %v3567_v60  ;;  %v3638_v60 = vld [vmem:[#allocation2 + $0x1e8] ss:$16 sps:$4 sm:$0xff]  }
  0x52   :  { %1317 = vmatpush2.bf16.msra.mxu1 %v3568_v61  ;;  %1275 = vmatprep.subr.bf16.mxu0 %v3569_v62  ;;  %v3641_v61 = vld [vmem:[#allocation2 + $0x5a0] ss:$16 sps:$4 sm:$0xff]   ;;  %v3646_v62 = vld [vmem:[#allocation2 + $0x1cc] ss:$16 sps:$4 sm:$0xff]  }
  0x53   :  { %1318 = vmatprep.subr.bf16.mxu1 %v3571_v63  ;;  %v3649_v63 = vld [vmem:[#allocation2 + $0x584] ss:$16 sps:$4 sm:$0xff]  }
  0x55   :  { %1276 = vmatpush2.bf16.msra.mxu0 %v3573_v0  ;;  %v3644_v0 = vld [vmem:[#allocation2 + $0x1c8] ss:$16 sps:$4 sm:$0xff]  }
  0x56   :  { %1319 = vmatpush2.bf16.msra.mxu1 %v3574_v1  ;;  %1277 = vmatprep.subr.bf16.mxu0 %v3575_v2  ;;  %v3647_v1 = vld [vmem:[#allocation2 + $0x580] ss:$16 sps:$4 sm:$0xff]   ;;  %v3652_v2 = vld [vmem:[#allocation2 + $0x1ac] ss:$16 sps:$4 sm:$0xff]  }
  0x57   :  { %1320 = vmatprep.subr.bf16.mxu1 %v3577_v3  ;;  %v3655_v3 = vld [vmem:[#allocation2 + $0x564] ss:$16 sps:$4 sm:$0xff]  }
  0x59   :  { %1278 = vmatpush2.bf16.msra.mxu0 %v3579_v4  ;;  %v3650_v4 = vld [vmem:[#allocation2 + $0x1a8] ss:$16 sps:$4 sm:$0xff]  }
  0x5a   :  { %1321 = vmatpush2.bf16.msra.mxu1 %v3580_v5  ;;  %1333 = vmatprep.subr.bf16.mxu0 %v3583_v10  ;;  %v3653_v5 = vld [vmem:[#allocation2 + $0x560] ss:$16 sps:$4 sm:$0xff]   ;;  %v3664_v10 = vld [vmem:[#allocation2 + $0x16c] ss:$16 sps:$4 sm:$0xff]  }
  0x5b   :  { %1390 = vmatprep.subr.bf16.mxu1 %v3586_v11  ;;  %v3667_v11 = vld [vmem:[#allocation2 + $0x524] ss:$16 sps:$4 sm:$0xff]  }
  0x5c   :  { %1280 = vmatmul.mubr.bf16.vlgmr.msra.gmra.mxu0 %v4113_v12 }
  0x5d   :  { %1323 = vmatmul.mubr.bf16.vlgmr.msra.gmra.mxu1 %v4115_v13  ;;  %1334 = vmatpush1.bf16.msra.mxu0 %v3581_v14  ;;  %v3662_v14 = vld [vmem:[#allocation2 + $0x168] ss:$16 sps:$4 sm:$0xff]  }
  0x5e   :  { %1391 = vmatpush1.bf16.msra.mxu1 %v3584_v15  ;;  %1335 = vmatprep.subr.bf16.mxu0 %v3589_v16  ;;  %v3665_v15 = vld [vmem:[#allocation2 + $0x520] ss:$16 sps:$4 sm:$0xff]   ;;  %v3670_v16 = vld [vmem:[#allocation2 + $0x14c] ss:$16 sps:$4 sm:$0xff]  }
  0x5f   :  { %1408 = vmatprep.mubr.bf16.mxu1 %v4051_v21  ;;  %1419 = vmatprep.subr.bf16.mxu1 %v3592_v17  ;;  %v3673_v17 = vld [vmem:[#allocation2 + $0x504] ss:$16 sps:$4 sm:$0xff]  }
  0x60   :  { %1365 = vmatprep.mubr.bf16.mxu0 %v4137_v44 }
  0x61   :  { %1336 = vmatpush1.bf16.msra.mxu0 %v3587_v18  ;;  %v3668_v18 = vld [vmem:[#allocation2 + $0x148] ss:$16 sps:$4 sm:$0xff]  }
  0x62   :  { %1337 = vmatprep.subr.bf16.mxu0 %v3595_v22  ;;  %v57_v22 = vld [vmem:[%s4264_s0 + $0x58] sm:$0xff] }
  0x65   :  { %3137 = vmatmul.mubr.msk.bf16.vlgmr.msra.gmra.mxu1 %vm1243_vm0, %v4126_v23  ;;  %1338 = vmatpush1.bf16.msra.mxu0 %v3593_v25  ;;  %v3679_v25 = vld [vmem:[#allocation2 + $0x2ec] ss:$16 sps:$4 sm:$0xff]  }
  0x66   :  { %1420 = vmatpush1.bf16.msra.mxu1 %v3590_v24  ;;  %1339 = vmatprep.subr.bf16.mxu0 %v3601_v27  ;;  %v3676_v24 = vld [vmem:[#allocation2 + $0x12c] ss:$16 sps:$4 sm:$0xff]   ;;  %v3674_v27 = vld [vmem:[#allocation2 + $0x128] ss:$16 sps:$4 sm:$0xff]  }
  0x67   :  { %1421 = vmatprep.subr.bf16.mxu1 %v3598_v26  ;;  %1451 = vmatprep.mubr.bf16.mxu1 %v4095_v53  ;;  %v3634_v53 = vld [vmem:[#allocation2 + $0xc] ss:$16 sps:$4 sm:$0xff]   ;;  %v4146_v26 = vpack.c.bf16 %v57_v22, %v50_v20  ;;  %v3758_v20 = vld [vmem:[#allocation2 + $0x568] ss:$16 sps:$4 sm:$0xff]  }
  0x68   :  { %v3761_v22 = vld [vmem:[#allocation2 + $0x328] ss:$16 sps:$4 sm:$0xff]  }
  0x69   :  { %1340 = vmatpush1.bf16.msra.mxu0 %v3599_v29  ;;  %v3682_v29 = vld [vmem:[#allocation2 + $0x10c] ss:$16 sps:$4 sm:$0xff]  }
  0x6a   :  { %1422 = vmatpush1.bf16.msra.mxu1 %v3596_v28  ;;  %1341 = vmatprep.subr.bf16.mxu0 %v3607_v31  ;;  %v3677_v28 = vld [vmem:[#allocation2 + $0x2e8] ss:$16 sps:$4 sm:$0xff]  }
  0x6b   :  { %1423 = vmatprep.subr.bf16.mxu1 %v3604_v30  ;;  %v3685_v30 = vld [vmem:[#allocation2 + $0x2cc] ss:$16 sps:$4 sm:$0xff]   ;;  %v3680_v31 = vld [vmem:[#allocation2 + $0x108] ss:$16 sps:$4 sm:$0xff]  }
  0x6d   :  { %1342 = vmatpush1.bf16.msra.mxu0 %v3605_v33  ;;  %v3688_v33 = vld [vmem:[#allocation2 + $0x4ec] ss:$16 sps:$4 sm:$0xff]  }
  0x6e   :  { %1424 = vmatpush1.bf16.msra.mxu1 %v3602_v32  ;;  %1343 = vmatprep.subr.bf16.mxu0 %v3613_v35  ;;  %v3683_v32 = vld [vmem:[#allocation2 + $0x2c8] ss:$16 sps:$4 sm:$0xff]  }
  0x6f   :  { %1425 = vmatprep.subr.bf16.mxu1 %v3610_v34  ;;  %v3691_v34 = vld [vmem:[#allocation2 + $0x2ac] ss:$16 sps:$4 sm:$0xff]   ;;  %v3686_v35 = vld [vmem:[#allocation2 + $0x4e8] ss:$16 sps:$4 sm:$0xff]  }
  0x71   :  { %1344 = vmatpush1.bf16.msra.mxu0 %v3611_v37  ;;  %v3694_v37 = vld [vmem:[#allocation2 + $0x4cc] ss:$16 sps:$4 sm:$0xff]  }
  0x72   :  { %1426 = vmatpush1.bf16.msra.mxu1 %v3608_v36  ;;  %1345 = vmatprep.subr.bf16.mxu0 %v3619_v39  ;;  %v3689_v36 = vld [vmem:[#allocation2 + $0x2a8] ss:$16 sps:$4 sm:$0xff]  }
  0x73   :  { %1427 = vmatprep.subr.bf16.mxu1 %v3616_v38  ;;  %v3697_v38 = vld [vmem:[#allocation2 + $0x28c] ss:$16 sps:$4 sm:$0xff]   ;;  %v3692_v39 = vld [vmem:[#allocation2 + $0x4c8] ss:$16 sps:$4 sm:$0xff]  }
  0x75   :  { %1346 = vmatpush1.bf16.msra.mxu0 %v3617_v43  ;;  %v3698_v43 = vld [vmem:[#allocation2 + $0x4a8] ss:$16 sps:$4 sm:$0xff]  }
  0x76   :  { %1428 = vmatpush1.bf16.msra.mxu1 %v3614_v40  ;;  %1347 = vmatprep.subr.bf16.mxu0 %v3625_v46  ;;  %v3695_v40 = vld [vmem:[#allocation2 + $0x288] ss:$16 sps:$4 sm:$0xff]   ;;  %v3709_v46 = vld [vmem:[#allocation2 + $0x24c] ss:$16 sps:$4 sm:$0xff]  }
  0x77   :  { %1429 = vmatprep.subr.bf16.mxu1 %v3622_v45  ;;  %v3701_v45 = vld [vmem:[#allocation2 + $0x268] ss:$16 sps:$4 sm:$0xff]  }
  0x79   :  { %1348 = vmatpush1.bf16.msra.mxu0 %v3623_v48  ;;  %v3712_v48 = vld [vmem:[#allocation2 + $0x46c] ss:$16 sps:$4 sm:$0xff]  }
  0x7a   :  { %1430 = vmatpush1.bf16.msra.mxu1 %v3620_v47  ;;  %1349 = vmatprep.subr.bf16.mxu0 %v3631_v50  ;;  %v3704_v47 = vld [vmem:[#allocation2 + $0x488] ss:$16 sps:$4 sm:$0xff]  }
  0x7b   :  { %1431 = vmatprep.subr.bf16.mxu1 %v3628_v49  ;;  %v3715_v49 = vld [vmem:[#allocation2 + $0x22c] ss:$16 sps:$4 sm:$0xff]   ;;  %v3710_v50 = vld [vmem:[#allocation2 + $0x468] ss:$16 sps:$4 sm:$0xff]  }
  0x7d   :  { %1350 = vmatpush2.bf16.msra.mxu0 %v3629_v52  ;;  %v3718_v52 = vld [vmem:[#allocation2 + $0x44c] ss:$16 sps:$4 sm:$0xff]  }
  0x7e   :  { %1432 = vmatpush1.bf16.msra.mxu1 %v3626_v51  ;;  %1351 = vmatprep.subr.bf16.mxu0 %v3637_v55  ;;  %v3713_v51 = vld [vmem:[#allocation2 + $0x228] ss:$16 sps:$4 sm:$0xff]  }
  0x7f   :  { %1433 = vmatprep.subr.bf16.mxu1 %v3634_v53  ;;  %v3721_v53 = vld [vmem:[#allocation2 + $0x20c] ss:$16 sps:$4 sm:$0xff]   ;;  %v3719_v55 = vld [vmem:[#allocation2 + $0x208] ss:$16 sps:$4 sm:$0xff]  }
  0x81   :  { %1352 = vmatpush2.bf16.msra.mxu0 %v3635_v57  ;;  %v3727_v57 = vld [vmem:[#allocation2 + $0x3ec] ss:$16 sps:$4 sm:$0xff]  }
  0x82   :  { %1434 = vmatpush1.bf16.msra.mxu1 %v3632_v56  ;;  %1353 = vmatprep.subr.bf16.mxu0 %v3643_v59  ;;  %v3724_v56 = vld [vmem:[#allocation2 + $0x42c] ss:$16 sps:$4 sm:$0xff]   ;;  %v3725_v59 = vld [vmem:[#allocation2 + $0x3e8] ss:$16 sps:$4 sm:$0xff]  }
  0x83   :  { %1435 = vmatprep.subr.bf16.mxu1 %v3640_v58  ;;  %v3722_v58 = vld [vmem:[#allocation2 + $0x428] ss:$16 sps:$4 sm:$0xff]  }
  0x85   :  { %1354 = vmatpush2.bf16.msra.mxu0 %v3641_v61  ;;  %v3733_v61 = vld [vmem:[#allocation2 + $0x3cc] ss:$16 sps:$4 sm:$0xff]  }
  0x86   :  { %1436 = vmatpush2.bf16.msra.mxu1 %v3638_v60  ;;  %1355 = vmatprep.subr.bf16.mxu0 %v3649_v63  ;;  %v3730_v60 = vld [vmem:[#allocation2 + $0x40c] ss:$16 sps:$4 sm:$0xff]   ;;  %v3731_v63 = vld [vmem:[#allocation2 + $0x3c8] ss:$16 sps:$4 sm:$0xff]  }
  0x87   :  { %1437 = vmatprep.subr.bf16.mxu1 %v3646_v62  ;;  %v3728_v62 = vld [vmem:[#allocation2 + $0x408] ss:$16 sps:$4 sm:$0xff]  }
  0x89   :  { %1356 = vmatpush2.bf16.msra.mxu0 %v3647_v1  ;;  %v3739_v1 = vld [vmem:[#allocation2 + $0x3ac] ss:$16 sps:$4 sm:$0xff]  }
  0x8a   :  { %1438 = vmatpush2.bf16.msra.mxu1 %v3644_v0  ;;  %1357 = vmatprep.subr.bf16.mxu0 %v3655_v3  ;;  %v3736_v0 = vld [vmem:[#allocation2 + $0x5ec] ss:$16 sps:$4 sm:$0xff]   ;;  %v3737_v3 = vld [vmem:[#allocation2 + $0x3a8] ss:$16 sps:$4 sm:$0xff]  }
  0x8b   :  { %1439 = vmatprep.subr.bf16.mxu1 %v3652_v2  ;;  %v3734_v2 = vld [vmem:[#allocation2 + $0x5e8] ss:$16 sps:$4 sm:$0xff]  }
  0x8d   :  { %1358 = vmatpush2.bf16.msra.mxu0 %v3653_v5  ;;  %v3745_v5 = vld [vmem:[#allocation2 + $0x38c] ss:$16 sps:$4 sm:$0xff]  }
  0x8e   :  { %1440 = vmatpush2.bf16.msra.mxu1 %v3650_v4  ;;  %1359 = vmatprep.subr.bf16.mxu0 %v3661_v7  ;;  %v3742_v4 = vld [vmem:[#allocation2 + $0x5cc] ss:$16 sps:$4 sm:$0xff]   ;;  %v3743_v7 = vld [vmem:[#allocation2 + $0x388] ss:$16 sps:$4 sm:$0xff]  }
  0x8f   :  { %1441 = vmatprep.subr.bf16.mxu1 %v3658_v6  ;;  %v3740_v6 = vld [vmem:[#allocation2 + $0x5c8] ss:$16 sps:$4 sm:$0xff]  }
  0x91   :  { %1360 = vmatpush2.bf16.msra.mxu0 %v3659_v9  ;;  %v3751_v9 = vld [vmem:[#allocation2 + $0x36c] ss:$16 sps:$4 sm:$0xff]  }
  0x92   :  { %1442 = vmatpush2.bf16.msra.mxu1 %v3656_v8  ;;  %1361 = vmatprep.subr.bf16.mxu0 %v3667_v11  ;;  %v3748_v8 = vld [vmem:[#allocation2 + $0x5ac] ss:$16 sps:$4 sm:$0xff]   ;;  %v3749_v11 = vld [vmem:[#allocation2 + $0x368] ss:$16 sps:$4 sm:$0xff]  }
  0x93   :  { %1443 = vmatprep.subr.bf16.mxu1 %v3664_v10  ;;  %v3746_v10 = vld [vmem:[#allocation2 + $0x5a8] ss:$16 sps:$4 sm:$0xff]  }
  0x95   :  { %1362 = vmatpush2.bf16.msra.mxu0 %v3665_v15  ;;  %v3757_v15 = vld [vmem:[#allocation2 + $0x34c] ss:$16 sps:$4 sm:$0xff]  }
  0x96   :  { %1444 = vmatpush2.bf16.msra.mxu1 %v3662_v14  ;;  %1363 = vmatprep.subr.bf16.mxu0 %v3673_v17  ;;  %v3754_v14 = vld [vmem:[#allocation2 + $0x58c] ss:$16 sps:$4 sm:$0xff]   ;;  %v3755_v17 = vld [vmem:[#allocation2 + $0x348] ss:$16 sps:$4 sm:$0xff]  }
  0x97   :  { %1445 = vmatprep.subr.bf16.mxu1 %v3670_v16  ;;  %v3752_v16 = vld [vmem:[#allocation2 + $0x588] ss:$16 sps:$4 sm:$0xff]  }
  0x99   :  { %1364 = vmatpush2.bf16.msra.mxu0 %v3671_v19  ;;  %v3763_v19 = vld [vmem:[#allocation2 + $0x32c] ss:$16 sps:$4 sm:$0xff]  }
  0x9a   :  { %1446 = vmatpush2.bf16.msra.mxu1 %v3668_v18  ;;  %1462 = vmatprep.subr.bf16.mxu0 %v3679_v25  ;;  %v3760_v18 = vld [vmem:[#allocation2 + $0x56c] ss:$16 sps:$4 sm:$0xff]  }
  0x9b   :  { %1447 = vmatprep.subr.bf16.mxu1 %v3676_v24  ;;  %v3766_v24 = vld [vmem:[#allocation2 + $0x54c] ss:$16 sps:$4 sm:$0xff]  }
  0x9c   :  { %1366 = vmatmul.mubr.bf16.vlgmr.msra.gmra.mxu0 %v4146_v26  ;;  %v3769_v25 = vld [vmem:[#allocation2 + $0x30c] ss:$16 sps:$4 sm:$0xff]  }
  0x9d   :  { %1463 = vmatpush1.bf16.msra.mxu0 %v3677_v28  ;;  %1494 = vmatprep.mubr.bf16.mxu0 %v4097_v54  ;;  %v3706_v54 = vld [vmem:[#allocation2 + $0x48c] ss:$16 sps:$4 sm:$0xff]   ;;  %v3767_v28 = vld [vmem:[#allocation2 + $0x308] ss:$16 sps:$4 sm:$0xff]  }
  0x9e   :  { %1448 = vmatpush2.bf16.msra.mxu1 %v3674_v27  ;;  %1464 = vmatprep.subr.bf16.mxu0 %v3685_v30  ;;  %v3764_v27 = vld [vmem:[#allocation2 + $0x548] ss:$16 sps:$4 sm:$0xff]   ;;  %v3775_v30 = vld [vmem:[#allocation2 + $0x60c] ss:$16 sps:$4 sm:$0xff]  }
  0x9f   :  { %1449 = vmatprep.subr.bf16.mxu1 %v3682_v29  ;;  %v3772_v29 = vld [vmem:[#allocation2 + $0x52c] ss:$16 sps:$4 sm:$0xff]  }
  0xa1   :  { %1465 = vmatpush1.bf16.msra.mxu0 %v3683_v32  ;;  %v3773_v32 = vld [vmem:[#allocation2 + $0x608] ss:$16 sps:$4 sm:$0xff]  }
  0xa2   :  { %1450 = vmatpush2.bf16.msra.mxu1 %v3680_v31  ;;  %1466 = vmatprep.subr.bf16.mxu0 %v3691_v34  ;;  %v3770_v31 = vld [vmem:[#allocation2 + $0x528] ss:$16 sps:$4 sm:$0xff]   ;;  %v3781_v34 = vld [vmem:[#allocation4 + $0xe4] ss:$16 sps:$4 sm:$0xff]  }
  0xa3   :  { %1505 = vmatprep.subr.bf16.mxu1 %v3688_v33  ;;  %v3778_v33 = vld [vmem:[#allocation2 + $0x50c] ss:$16 sps:$4 sm:$0xff]  }
  0xa5   :  { %1452 = vmatmul.mubr.bf16.vlgmr.msra.gmra.mxu1 %v4113_v12  ;;  %1467 = vmatpush1.bf16.msra.mxu0 %v3689_v36  ;;  %v3707_v12 = vld [vmem:[#allocation2 + $0x248] ss:$16 sps:$4 sm:$0xff]   ;;  %v3779_v36 = vld [vmem:[#allocation4 + $0xe0] ss:$16 sps:$4 sm:$0xff]  }
  0xa6   :  { %1506 = vmatpush1.bf16.msra.mxu1 %v3686_v35  ;;  %1468 = vmatprep.subr.bf16.mxu0 %v3697_v38  ;;  %v3776_v35 = vld [vmem:[#allocation2 + $0x508] ss:$16 sps:$4 sm:$0xff]   ;;  %v3782_v38 = vld [vmem:[#allocation4 + $0xc0] ss:$16 sps:$4 sm:$0xff]  }
  0xa7   :  { %1507 = vmatprep.subr.bf16.mxu1 %v3694_v37  ;;  %1537 = vmatprep.mubr.bf16.mxu1 %v4137_v44  ;;  %v3716_v44 = vld [vmem:[#allocation2 + $0x448] ss:$16 sps:$4 sm:$0xff]   ;;  %v3784_v37 = vld [vmem:[#allocation4 + $0xc4] ss:$16 sps:$4 sm:$0xff]  }
  0xa9   :  { %1469 = vmatpush1.bf16.msra.mxu0 %v3695_v40  ;;  %v3790_v40 = vld [vmem:[#allocation4 + $0x84] ss:$16 sps:$4 sm:$0xff]  }
  0xaa   :  { %1508 = vmatpush1.bf16.msra.mxu1 %v3692_v39  ;;  %1470 = vmatprep.subr.bf16.mxu0 %v3703_v42  ;;  %v3787_v39 = vld [vmem:[#allocation4 + $0xa4] ss:$16 sps:$4 sm:$0xff]   ;;  %v3791_v42 = vld [vmem:[#allocation4 + $0x60] ss:$16 sps:$4 sm:$0xff]  }
  0xab   :  { %1509 = vmatprep.subr.bf16.mxu1 %v3700_v41  ;;  %v3788_v41 = vld [vmem:[#allocation4 + $0x80] ss:$16 sps:$4 sm:$0xff]  }
  0xad   :  { %1471 = vmatpush1.bf16.msra.mxu0 %v3701_v45  ;;  %v3797_v45 = vld [vmem:[#allocation4 + $0x20] ss:$16 sps:$4 sm:$0xff]  }
  0xae   :  { %1510 = vmatpush1.bf16.msra.mxu1 %v3698_v43  ;;  %1472 = vmatprep.subr.bf16.mxu0 %v3709_v46  ;;  %v3796_v43 = vld [vmem:[#allocation4 + $0x44] ss:$16 sps:$4 sm:$0xff]   ;;  %v3800_v46 = vld [vmem:[#allocation4] ss:$16 sps:$4 sm:$0xff]  }
  0xaf   :  { %1511 = vmatprep.subr.bf16.mxu1 %v3706_v54  ;;  %v3802_v54 = vld [vmem:[#allocation4 + $0x4] ss:$16 sps:$4 sm:$0xff]  }
  0xb1   :  { %1473 = vmatpush1.bf16.msra.mxu0 %v3707_v12  ;;  %v3835_v12 = vld [vmem:[#allocation4 + $0x2e4] ss:$16 sps:$4 sm:$0xff]  }
  0xb2   :  { %1512 = vmatpush1.bf16.msra.mxu1 %v3704_v47  ;;  %1474 = vmatprep.subr.bf16.mxu0 %v3715_v49  ;;  %v3833_v47 = vld [vmem:[#allocation4 + $0x2e0] ss:$16 sps:$4 sm:$0xff]  }
  0xb3   :  { %1513 = vmatprep.subr.bf16.mxu1 %v3712_v48  ;;  %v3805_v48 = vld [vmem:[#allocation4 + $0x1e4] ss:$16 sps:$4 sm:$0xff]   ;;  %v3803_v49 = vld [vmem:[#allocation4 + $0x1e0] ss:$16 sps:$4 sm:$0xff]  }
  0xb5   :  { %1475 = vmatpush1.bf16.msra.mxu0 %v3713_v51  ;;  %v3841_v51 = vld [vmem:[#allocation4 + $0x2c4] ss:$16 sps:$4 sm:$0xff]  }
  0xb6   :  { %1514 = vmatpush1.bf16.msra.mxu1 %v3710_v50  ;;  %1476 = vmatprep.subr.bf16.mxu0 %v3721_v53  ;;  %v3839_v50 = vld [vmem:[#allocation4 + $0x2c0] ss:$16 sps:$4 sm:$0xff]  }
  0xb7   :  { %1515 = vmatprep.subr.bf16.mxu1 %v3718_v52  ;;  %v3808_v52 = vld [vmem:[#allocation4 + $0x1c4] ss:$16 sps:$4 sm:$0xff]   ;;  %v3806_v53 = vld [vmem:[#allocation4 + $0x1c0] ss:$16 sps:$4 sm:$0xff]  }
  0xb9   :  { %1477 = vmatpush1.bf16.msra.mxu0 %v3719_v55  ;;  %v3847_v55 = vld [vmem:[#allocation4 + $0x2a4] ss:$16 sps:$4 sm:$0xff]  }
  0xba   :  { %1516 = vmatpush1.bf16.msra.mxu1 %v3716_v44  ;;  %1478 = vmatprep.subr.bf16.mxu0 %v3727_v57  ;;  %v3845_v44 = vld [vmem:[#allocation4 + $0x2a0] ss:$16 sps:$4 sm:$0xff]  }
  0xbb   :  { %1517 = vmatprep.subr.bf16.mxu1 %v3724_v56  ;;  %v3811_v56 = vld [vmem:[#allocation4 + $0x1a4] ss:$16 sps:$4 sm:$0xff]   ;;  %v3809_v57 = vld [vmem:[#allocation4 + $0x1a0] ss:$16 sps:$4 sm:$0xff]  }
  0xbd   :  { %1479 = vmatpush2.bf16.msra.mxu0 %v3725_v59  ;;  %v3853_v59 = vld [vmem:[#allocation4 + $0x284] ss:$16 sps:$4 sm:$0xff]  }
  0xbe   :  { %1518 = vmatpush1.bf16.msra.mxu1 %v3722_v58  ;;  %1480 = vmatprep.subr.bf16.mxu0 %v3733_v61  ;;  %v3851_v58 = vld [vmem:[#allocation4 + $0x280] ss:$16 sps:$4 sm:$0xff]  }
  0xbf   :  { %1519 = vmatprep.subr.bf16.mxu1 %v3730_v60  ;;  %v3814_v60 = vld [vmem:[#allocation4 + $0x184] ss:$16 sps:$4 sm:$0xff]   ;;  %v3812_v61 = vld [vmem:[#allocation4 + $0x180] ss:$16 sps:$4 sm:$0xff]  }
  0xc1   :  { %1481 = vmatpush2.bf16.msra.mxu0 %v3731_v63  ;;  %v3859_v63 = vld [vmem:[#allocation4 + $0x264] ss:$16 sps:$4 sm:$0xff]  }
  0xc2   :  { %1520 = vmatpush1.bf16.msra.mxu1 %v3728_v62  ;;  %1482 = vmatprep.subr.bf16.mxu0 %v3739_v1  ;;  %v3857_v62 = vld [vmem:[#allocation4 + $0x260] ss:$16 sps:$4 sm:$0xff]  }
  0xc3   :  { %1521 = vmatprep.subr.bf16.mxu1 %v3736_v0  ;;  %v3817_v0 = vld [vmem:[#allocation4 + $0x164] ss:$16 sps:$4 sm:$0xff]   ;;  %v3815_v1 = vld [vmem:[#allocation4 + $0x160] ss:$16 sps:$4 sm:$0xff]  }
  0xc5   :  { %1483 = vmatpush2.bf16.msra.mxu0 %v3737_v3  ;;  %v3865_v3 = vld [vmem:[#allocation4 + $0x244] ss:$16 sps:$4 sm:$0xff]  }
  0xc6   :  { %1522 = vmatpush2.bf16.msra.mxu1 %v3734_v2  ;;  %1484 = vmatprep.subr.bf16.mxu0 %v3745_v5  ;;  %v3863_v2 = vld [vmem:[#allocation4 + $0x240] ss:$16 sps:$4 sm:$0xff]  }
  0xc7   :  { %1523 = vmatprep.subr.bf16.mxu1 %v3742_v4  ;;  %v3820_v4 = vld [vmem:[#allocation4 + $0x144] ss:$16 sps:$4 sm:$0xff]   ;;  %v3818_v5 = vld [vmem:[#allocation4 + $0x140] ss:$16 sps:$4 sm:$0xff]  }
  0xc9   :  { %1485 = vmatpush2.bf16.msra.mxu0 %v3743_v7  ;;  %v3871_v7 = vld [vmem:[#allocation4 + $0x224] ss:$16 sps:$4 sm:$0xff]  }
  0xca   :  { %1524 = vmatpush2.bf16.msra.mxu1 %v3740_v6  ;;  %1486 = vmatprep.subr.bf16.mxu0 %v3751_v9  ;;  %v3869_v6 = vld [vmem:[#allocation4 + $0x220] ss:$16 sps:$4 sm:$0xff]  }
  0xcb   :  { %1525 = vmatprep.subr.bf16.mxu1 %v3748_v8  ;;  %v3823_v8 = vld [vmem:[#allocation4 + $0x124] ss:$16 sps:$4 sm:$0xff]   ;;  %v3821_v9 = vld [vmem:[#allocation4 + $0x120] ss:$16 sps:$4 sm:$0xff]  }
  0xcd   :  { %1487 = vmatpush2.bf16.msra.mxu0 %v3749_v11  ;;  %v3877_v11 = vld [vmem:[#allocation4 + $0x204] ss:$16 sps:$4 sm:$0xff]  }
  0xce   :  { %1526 = vmatpush2.bf16.msra.mxu1 %v3746_v10  ;;  %1488 = vmatprep.subr.bf16.mxu0 %v3757_v15  ;;  %v3875_v10 = vld [vmem:[#allocation4 + $0x200] ss:$16 sps:$4 sm:$0xff]  }
  0xcf   :  { %1527 = vmatprep.subr.bf16.mxu1 %v3754_v14  ;;  %v3826_v14 = vld [vmem:[#allocation4 + $0x104] ss:$16 sps:$4 sm:$0xff]   ;;  %v3824_v15 = vld [vmem:[#allocation4 + $0x100] ss:$16 sps:$4 sm:$0xff]  }
  0xd1   :  { %1489 = vmatpush2.bf16.msra.mxu0 %v3755_v17  ;;  %v3883_v17 = vld [vmem:[#allocation4 + $0x3e4] ss:$16 sps:$4 sm:$0xff]  }
  0xd2   :  { %1528 = vmatpush2.bf16.msra.mxu1 %v3752_v16  ;;  %1490 = vmatprep.subr.bf16.mxu0 %v3763_v19  ;;  %v3881_v16 = vld [vmem:[#allocation4 + $0x3e0] ss:$16 sps:$4 sm:$0xff]  }
  0xd3   :  { %1529 = vmatprep.subr.bf16.mxu1 %v3760_v18  ;;  %v3829_v18 = vld [vmem:[#allocation4 + $0xec] ss:$16 sps:$4 sm:$0xff]   ;;  %v3887_v19 = vld [vmem:[#allocation4 + $0x3c0] ss:$16 sps:$4 sm:$0xff]  }
  0xd5   :  { %1491 = vmatpush2.bf16.msra.mxu0 %v3761_v22  ;;  %v3895_v22 = vld [vmem:[#allocation4 + $0x3a4] ss:$16 sps:$4 sm:$0xff]  }
  0xd6   :  { %1530 = vmatpush2.bf16.msra.mxu1 %v3758_v20  ;;  %1492 = vmatprep.subr.bf16.mxu0 %v3769_v25  ;;  %v3889_v20 = vld [vmem:[#allocation4 + $0x3c4] ss:$16 sps:$4 sm:$0xff]  }
  0xd7   :  { %1531 = vmatprep.subr.bf16.mxu1 %v3766_v24  ;;  %v3893_v24 = vld [vmem:[#allocation4 + $0x3a0] ss:$16 sps:$4 sm:$0xff]   ;;  %v3901_v25 = vld [vmem:[#allocation4 + $0x384] ss:$16 sps:$4 sm:$0xff]  }
  0xd9   :  { %1493 = vmatpush2.bf16.msra.mxu0 %v3767_v28  ;;  %v3907_v28 = vld [vmem:[#allocation4 + $0x364] ss:$16 sps:$4 sm:$0xff]  }
  0xda   :  { %1532 = vmatpush2.bf16.msra.mxu1 %v3764_v27  ;;  %1562 = vmatprep.subr.bf16.mxu0 %v3775_v30  ;;  %v3899_v27 = vld [vmem:[#allocation4 + $0x380] ss:$16 sps:$4 sm:$0xff]   ;;  %v3913_v30 = vld [vmem:[#allocation4 + $0x344] ss:$16 sps:$4 sm:$0xff]  }
  0xdb   :  { %1533 = vmatprep.subr.bf16.mxu1 %v3772_v29  ;;  %v3905_v29 = vld [vmem:[#allocation4 + $0x360] ss:$16 sps:$4 sm:$0xff]  }
  0xdc   :  { %1495 = vmatmul.mubr.bf16.vlgmr.msra.gmra.mxu0 %v4115_v13  ;;  %v3785_v13 = vld [vmem:[#allocation4 + $0xa0] ss:$16 sps:$4 sm:$0xff]  }
  0xdd   :  { %1563 = vmatpush1.bf16.msra.mxu0 %v3773_v32  ;;  %1580 = vmatprep.mubr.bf16.mxu0 %v4051_v21  ;;  %v3793_v21 = vld [vmem:[#allocation4 + $0x64] ss:$16 sps:$4 sm:$0xff]  }
  0xde   :  { %1534 = vmatpush2.bf16.msra.mxu1 %v3770_v31  ;;  %2387 = vmatprep.subr.bf16.mxu0 %v3781_v34  ;;  %v3911_v31 = vld [vmem:[#allocation4 + $0x340] ss:$16 sps:$4 sm:$0xff]   ;;  %v3919_v32 = vld [vmem:[#allocation4 + $0x324] ss:$16 sps:$4 sm:$0xff]  }
  0xdf   :  { %1535 = vmatprep.subr.bf16.mxu1 %v3778_v33  ;;  %v3917_v33 = vld [vmem:[#allocation4 + $0x320] ss:$16 sps:$4 sm:$0xff]  }
  0xe0   :  { %v3920_v34 = vld [vmem:[#allocation4 + $0x300] ss:$16 sps:$4 sm:$0xff]  }
  0xe2   :  { %1536 = vmatpush2.bf16.msra.mxu1 %v3776_v35  ;;  %v3922_v35 = vld [vmem:[#allocation4 + $0x304] ss:$16 sps:$4 sm:$0xff]  }
  0xe3   :  { %2430 = vmatprep.subr.bf16.mxu1 %v3835_v12 }
  0xe4   :  { %3138 = vmatmul.mubr.msk.bf16.vlgmr.msra.gmra.mxu0 %vm1243_vm0, %v4126_v23  ;;  %v3799_v23 = vld [vmem:[#allocation4 + $0x24] ss:$16 sps:$4 sm:$0xff]  }
  0xe5   :  { %1538 = vmatmul.mubr.bf16.vlgmr.msra.gmra.mxu1 %v4146_v26  ;;  %2388 = vmatpush1.bf16.msra.mxu0 %v3779_v36  ;;  %v3794_v26 = vld [vmem:[#allocation4 + $0x40] ss:$16 sps:$4 sm:$0xff]   ;;  %v3925_v36 = vld [vmem:[#allocation4 + $0x2ec] ss:$16 sps:$4 sm:$0xff]  }
  0xe6   :  { %2389 = vmatprep.subr.bf16.mxu0 %v3784_v37  ;;  %2431 = vmatpush1.bf16.msra.mxu1 %v3833_v47 }
  0xe7   :  { %2432 = vmatprep.subr.bf16.mxu1 %v3841_v51 }
  0xe9   :  { %2390 = vmatpush1.bf16.msra.mxu0 %v3782_v38 }
  0xea   :  { %2391 = vmatprep.subr.bf16.mxu0 %v3787_v39  ;;  %2433 = vmatpush1.bf16.msra.mxu1 %v3839_v50 }
  0xeb   :  { %2434 = vmatprep.subr.bf16.mxu1 %v3847_v55 }
  0xed   :  { %2392 = vmatpush1.bf16.msra.mxu0 %v3785_v13 }
  0xee   :  { %2393 = vmatprep.subr.bf16.mxu0 %v3790_v40  ;;  %2435 = vmatpush1.bf16.msra.mxu1 %v3845_v44 }
  0xef   :  { %2436 = vmatprep.subr.bf16.mxu1 %v3853_v59 }
  0xf1   :  { %2394 = vmatpush1.bf16.msra.mxu0 %v3788_v41 }
  0xf2   :  { %2395 = vmatprep.subr.bf16.mxu0 %v3793_v21  ;;  %2437 = vmatpush1.bf16.msra.mxu1 %v3851_v58 }
  0xf3   :  { %2438 = vmatprep.subr.bf16.mxu1 %v3859_v63 }
  0xf5   :  { %2396 = vmatpush1.bf16.msra.mxu0 %v3791_v42 }
  0xf6   :  { %2397 = vmatprep.subr.bf16.mxu0 %v3796_v43  ;;  %2439 = vmatpush1.bf16.msra.mxu1 %v3857_v62 }
  0xf7   :  { %2440 = vmatprep.subr.bf16.mxu1 %v3865_v3 }
  0xf9   :  { %2398 = vmatpush1.bf16.msra.mxu0 %v3794_v26 }
  0xfa   :  { %2399 = vmatprep.subr.bf16.mxu0 %v3799_v23  ;;  %2441 = vmatpush1.bf16.msra.mxu1 %v3863_v2 }
  0xfb   :  { %2442 = vmatprep.subr.bf16.mxu1 %v3871_v7 }
  0xfd   :  { %2400 = vmatpush1.bf16.msra.mxu0 %v3797_v45 }
  0xfe   :  { %2401 = vmatprep.subr.bf16.mxu0 %v3802_v54  ;;  %2443 = vmatpush1.bf16.msra.mxu1 %v3869_v6 }
  0xff   :  { %2444 = vmatprep.subr.bf16.mxu1 %v3877_v11 }
 0x101   :  { %2402 = vmatpush1.bf16.msra.mxu0 %v3800_v46 }
 0x102   :  { %2403 = vmatprep.subr.bf16.mxu0 %v3805_v48  ;;  %2445 = vmatpush1.bf16.msra.mxu1 %v3875_v10 }
 0x103   :  { %2446 = vmatprep.subr.bf16.mxu1 %v3883_v17 }
 0x105   :  { %2404 = vmatpush2.bf16.msra.mxu0 %v3803_v49 }
 0x106   :  { %2405 = vmatprep.subr.bf16.mxu0 %v3808_v52  ;;  %2447 = vmatpush2.bf16.msra.mxu1 %v3881_v16 }
 0x107   :  { %2448 = vmatprep.subr.bf16.mxu1 %v3889_v20 }
 0x109   :  { %2406 = vmatpush2.bf16.msra.mxu0 %v3806_v53 }
 0x10a   :  { %2407 = vmatprep.subr.bf16.mxu0 %v3811_v56  ;;  %2449 = vmatpush2.bf16.msra.mxu1 %v3887_v19 }
 0x10b   :  { %2450 = vmatprep.subr.bf16.mxu1 %v3895_v22 }
 0x10d   :  { %2408 = vmatpush2.bf16.msra.mxu0 %v3809_v57 }
 0x10e   :  { %2409 = vmatprep.subr.bf16.mxu0 %v3814_v60  ;;  %2451 = vmatpush2.bf16.msra.mxu1 %v3893_v24 }
 0x10f   :  { %2452 = vmatprep.subr.bf16.mxu1 %v3901_v25 }
 0x111   :  { %2410 = vmatpush2.bf16.msra.mxu0 %v3812_v61 }
 0x112   :  { %2411 = vmatprep.subr.bf16.mxu0 %v3817_v0  ;;  %2453 = vmatpush2.bf16.msra.mxu1 %v3899_v27 }
 0x113   :  { %2454 = vmatprep.subr.bf16.mxu1 %v3907_v28 }
 0x115   :  { %2412 = vmatpush2.bf16.msra.mxu0 %v3815_v1 }
 0x116   :  { %2413 = vmatprep.subr.bf16.mxu0 %v3820_v4  ;;  %2455 = vmatpush2.bf16.msra.mxu1 %v3905_v29 }
 0x117   :  { %2456 = vmatprep.subr.bf16.mxu1 %v3913_v30 }
 0x119   :  { %2414 = vmatpush2.bf16.msra.mxu0 %v3818_v5 }
 0x11a   :  { %2415 = vmatprep.subr.bf16.mxu0 %v3823_v8  ;;  %2457 = vmatpush2.bf16.msra.mxu1 %v3911_v31 }
 0x11b   :  { %2458 = vmatprep.subr.bf16.mxu1 %v3919_v32 }
 0x11c   :  { %v1281_v39 = vpop.f32.mrf.mxu0 }
 0x11d   :  { %2416 = vmatpush2.bf16.msra.mxu0 %v3821_v9  ;;  %v1324_v37 = vpop.f32.mrf.mxu1 }
 0x11e   :  { %2417 = vmatprep.subr.bf16.mxu0 %v3826_v14  ;;  %2459 = vmatpush2.bf16.msra.mxu1 %v3917_v33  ;;  %v1283_v40 = vpop.f32.mrf.mxu0  ;;  %v1325_v26 = vadd.f32 %v1324_v37, %v1281_v39 }
 0x11f   :  { %2460 = vmatprep.subr.bf16.mxu1 %v3922_v35  ;;  %v1326_v38 = vpop.f32.mrf.mxu1 }
 0x120   :  { %v1285_v21 = vpop.f32.mrf.mxu0  ;;  %v1327_v45 = vadd.f32 %v1326_v38, %v1283_v40  ;;  %v3827_v38 = vld [vmem:[#allocation4 + $0xe8] ss:$16 sps:$4 sm:$0xff]  }
 0x121   :  { %2418 = vmatpush2.bf16.msra.mxu0 %v3824_v15  ;;  %v1328_v13 = vpop.f32.mrf.mxu1  ;;  %v3830_v40 = vld [vmem:[#allocation4 + $0xc8] ss:$16 sps:$4 sm:$0xff]  }
 0x122   :  { %2473 = vmatprep.subr.bf16.mxu0 %v3829_v18  ;;  %2461 = vmatpush2.bf16.msra.mxu1 %v3920_v34  ;;  %v1287_v43 = vpop.f32.mrf.mxu0  ;;  %v1329_v12 = vadd.f32 %v1328_v13, %v1285_v21  ;;  %v3832_v13 = vld [vmem:[#allocation4 + $0xcc] ss:$16 sps:$4 sm:$0xff]   ;;  %v3836_v21 = vld [vmem:[#allocation4 + $0xa8] ss:$16 sps:$4 sm:$0xff]  }
 0x123   :  { %2516 = vmatprep.subr.bf16.mxu1 %v3925_v36  ;;  %v1330_v41 = vpop.f32.mrf.mxu1 }
 0x124   :  { %v1331_v55 = vadd.f32 %v1330_v41, %v1287_v43  ;;  %v3838_v41 = vld [vmem:[#allocation4 + $0xac] ss:$16 sps:$4 sm:$0xff]   ;;  %v3842_v43 = vld [vmem:[#allocation4 + $0x88] ss:$16 sps:$4 sm:$0xff]  }
 0x125   :  { %v1410_v42 = vpop.f32.mrf.mxu1 }
 0x127   :  { %v1412_v54 = vpop.f32.mrf.mxu1 }
 0x129   :  { %v1414_v51 = vpop.f32.mrf.mxu1 }
 0x12b   :  { %v1416_v61 = vpop.f32.mrf.mxu1 }
 0x15c   :  { %v1367_v23 = vpop.f32.mrf.mxu0 }
 0x15d   :  { %v1368_v46 = vadd.f32 %v1367_v23, %v1325_v26  ;;  %v3850_v26 = vld [vmem:[#allocation4 + $0x6c] ss:$16 sps:$4 sm:$0xff]   ;;  %v3848_v23 = vld [vmem:[#allocation4 + $0x68] ss:$16 sps:$4 sm:$0xff]  }
 0x15e   :  { %v1369_v47 = vpop.f32.mrf.mxu0 }
 0x15f   :  { %v1411_v48 = vadd.f32 %v1410_v42, %v1368_v46  ;;  %v1370_v49 = vadd.f32 %v1369_v47, %v1327_v45  ;;  %v3844_v42 = vld [vmem:[#allocation4 + $0x8c] ss:$16 sps:$4 sm:$0xff]   ;;  %v3860_v47 = vld [vmem:[#allocation4 + $0x28] ss:$16 sps:$4 sm:$0xff]  }
 0x160   :  { %v1371_v50 = vpop.f32.mrf.mxu0  ;;  %v3856_v45 = vld [vmem:[#allocation4 + $0x4c] ss:$16 sps:$4 sm:$0xff]  }
 0x161   :  { %v1591_v52 = vmax.f32 %v1411_v48, 0.0  ;;  %v1413_v53 = vadd.f32 %v1412_v54, %v1370_v49  ;;  %v1372_v44 = vadd.f32 %v1371_v50, %v1329_v12  ;;  %v3854_v54 = vld [vmem:[#allocation4 + $0x48] ss:$16 sps:$4 sm:$0xff]   ;;  %v3862_v46 = vld [vmem:[#allocation4 + $0x2c] ss:$16 sps:$4 sm:$0xff]  }
 0x162   :  { %v1373_v56 = vpop.f32.mrf.mxu0  ;;  %v3868_v12 = vld [vmem:[#allocation4 + $0xc] ss:$16 sps:$4 sm:$0xff]   ;;  %v3866_v48 = vld [vmem:[#allocation4 + $0x8] ss:$16 sps:$4 sm:$0xff]  }
 0x163   :  { %v3354_v57 = vcvt.f32.s32 %v1591_v52  ;;  %v1592_v58 = vmax.f32 %v1413_v53, 0.0  ;;  %v1415_v59 = vadd.f32 %v1414_v51, %v1372_v44  ;;  %v1374_v60 = vadd.f32 %v1373_v56, %v1331_v55  ;;  %v3874_v49 = vld [vmem:[#allocation4 + $0x1ec] ss:$16 sps:$4 sm:$0xff]   ;;  %v3872_v50 = vld [vmem:[#allocation4 + $0x1e8] ss:$16 sps:$4 sm:$0xff]  }
 0x164   :  { %v3352_v7 = vand.u32 2147483647, %v1591_v52  ;;  %v3357_v11 = vand.u32 2147483648, %v1591_v52  ;;  %v3878_v53 = vld [vmem:[#allocation4 + $0x1c8] ss:$16 sps:$4 sm:$0xff]  }
 0x165   :  { %v3355_v62 = vcvt.s32.f32 %v3354_v57  ;;  %v3362_v63 = vcvt.f32.s32 %v1592_v58  ;;  %v1595_v0 = vmax.f32 %v1415_v59, 0.0  ;;  %v1417_v1 = vadd.f32 %v1416_v61, %v1374_v60  ;;  %v1453_v51 = vpop.f32.mrf.mxu1  ;;  %v3886_v55 = vld [vmem:[#allocation4 + $0x1ac] ss:$16 sps:$4 sm:$0xff]   ;;  %v3884_v57 = vld [vmem:[#allocation4 + $0x1a8] ss:$16 sps:$4 sm:$0xff]  }
 0x166   :  { %v3365_v8 = vand.u32 2147483648, %v1592_v58  ;;  %v3360_v15 = vand.u32 2147483647, %v1592_v58  ;;  %vm3353_vm3 = vcmp.lt.f32.partialorder %v3352_v7, 8388608.0  ;;  %v3892_v60 = vld [vmem:[#allocation4 + $0x18c] ss:$16 sps:$4 sm:$0xff]  }
 0x167   :  { %v3363_v2 = vcvt.s32.f32 %v3362_v63  ;;  %v3386_v3 = vcvt.f32.s32 %v1595_v0  ;;  %v1596_v4 = vmax.f32 %v1417_v1, 0.0  ;;  %v3356_v5 = vand.u32 2147483647, %v3355_v62  ;;  %v1455_v44 = vpop.f32.mrf.mxu1  ;;  %v3890_v62 = vld [vmem:[#allocation4 + $0x188] ss:$16 sps:$4 sm:$0xff]  }
 0x168   :  { %v3384_v14 = vand.u32 2147483647, %v1595_v0  ;;  %v3389_v17 = vand.u32 2147483648, %v1595_v0  ;;  %vm3361_vm2 = vcmp.lt.f32.partialorder %v3360_v15, 8388608.0  ;;  %v3898_v1 = vld [vmem:[#allocation4 + $0x16c] ss:$16 sps:$4 sm:$0xff]  }
 0x169   :  { %v3364_v6 = vand.u32 2147483647, %v3363_v2  ;;  %v3387_v9 = vcvt.s32.f32 %v3386_v3  ;;  %v3394_v10 = vcvt.f32.s32 %v1596_v4  ;;  %v3358_v20 = vor.u32 %v3357_v11, %v3356_v5  ;;  %v3896_v7 = vld [vmem:[#allocation4 + $0x168] ss:$16 sps:$4 sm:$0xff]  }
 0x16a   :  { %v3392_v22 = vand.u32 2147483647, %v1596_v4  ;;  %v3397_v27 = vand.u32 2147483648, %v1596_v4  ;;  %vm3385_vm1 = vcmp.lt.f32.partialorder %v3384_v14, 8388608.0 }
 0x16b   :  { %v3388_v16 = vand.u32 2147483647, %v3387_v9  ;;  %v3395_v18 = vcvt.s32.f32 %v3394_v10  ;;  %v3366_v19 = vor.u32 %v3365_v8, %v3364_v6  ;;  %v3359_v31 = vsel %vm3353_vm3, %v3358_v20, %v1591_v52  ;;  %v3880_v52 = vld [vmem:[#allocation4 + $0x1cc] ss:$16 sps:$4 sm:$0xff]  }
 0x16c   :  { %vm3393_vm4 = vcmp.lt.f32.partialorder %v3392_v22, 8388608.0  ;;  %v1607_v36 = vmin.f32 %v3359_v31, 255.0  ;;  %v3904_v10 = vld [vmem:[#allocation4 + $0x14c] ss:$16 sps:$4 sm:$0xff]   ;;  %v3902_v22 = vld [vmem:[#allocation4 + $0x148] ss:$16 sps:$4 sm:$0xff]  }
 0x16d   :  { %v3390_v24 = vor.u32 %v3389_v17, %v3388_v16  ;;  %v3396_v25 = vand.u32 2147483647, %v3395_v18  ;;  %v3367_v28 = vsel %vm3361_vm2, %v3366_v19, %v1592_v58  ;;  %v1457_v58 = vpop.f32.mrf.mxu1 }
 0x16e   :  { %v1608_v34 = vmin.f32 %v3367_v28, 255.0 }
 0x16f   :  { %v3398_v29 = vor.u32 %v3397_v27, %v3396_v25  ;;  %v3391_v30 = vsel %vm3385_vm1, %v3390_v24, %v1595_v0  ;;  %v1459_v63 = vpop.f32.mrf.mxu1  ;;  %v3910_v27 = vld [vmem:[#allocation4 + $0x12c] ss:$16 sps:$4 sm:$0xff]  }
 0x170   :  { %v1611_v33 = vmin.f32 %v3391_v30, 255.0 }
 0x171   :  { %v3399_v32 = vsel %vm3393_vm4, %v3398_v29, %v1596_v4 }
 0x172   :  { %v1612_v35 = vmin.f32 %v3399_v32, 255.0  ;;  %v4157_v39 = vpack.c.bf16 %v1611_v33, %v1607_v36 }
 0x174   :  { %v1616_v37 = vpack.c.bf16 %v1612_v35, %v1608_v34  ;;  %v3908_v35 = vld [vmem:[#allocation4 + $0x128] ss:$16 sps:$4 sm:$0xff]  }
 0x176   :  { %2419 = vmatprep.mubr.bf16.mxu0 %v1616_v37 }
 0x177   :  { %2420 = vmatmul.mubr.bf16.vlgmr.msra.gmra.mxu0 %v4157_v39 }
 0x178   :  { %2474 = vmatpush1.bf16.msra.mxu0 %v3827_v38  ;;  %2505 = vmatprep.mubr.bf16.mxu0 %v1616_v37  ;;  %v3916_v38 = vld [vmem:[#allocation4 + $0x10c] ss:$16 sps:$4 sm:$0xff]  }
 0x179   :  { %2475 = vmatprep.subr.bf16.mxu0 %v3832_v13 }
 0x17c   :  { %2476 = vmatpush1.bf16.msra.mxu0 %v3830_v40 }
 0x17d   :  { %2477 = vmatprep.subr.bf16.mxu0 %v3838_v41 }
 0x180   :  { %2478 = vmatpush1.bf16.msra.mxu0 %v3836_v21 }
 0x181   :  { %2479 = vmatprep.subr.bf16.mxu0 %v3844_v42 }
 0x184   :  { %2480 = vmatpush1.bf16.msra.mxu0 %v3842_v43  ;;  %v3914_v43 = vld [vmem:[#allocation4 + $0x108] ss:$16 sps:$4 sm:$0xff]  }
 0x185   :  { %2481 = vmatprep.subr.bf16.mxu0 %v3850_v26 }
 0x188   :  { %2482 = vmatpush1.bf16.msra.mxu0 %v3848_v23 }
 0x189   :  { %2483 = vmatprep.subr.bf16.mxu0 %v3856_v45 }
 0x18c   :  { %2484 = vmatpush1.bf16.msra.mxu0 %v3854_v54 }
 0x18d   :  { %2485 = vmatprep.subr.bf16.mxu0 %v3862_v46 }
 0x190   :  { %2486 = vmatpush1.bf16.msra.mxu0 %v3860_v47 }
 0x191   :  { %2487 = vmatprep.subr.bf16.mxu0 %v3868_v12 }
 0x194   :  { %2488 = vmatpush1.bf16.msra.mxu0 %v3866_v48 }
 0x195   :  { %2489 = vmatprep.subr.bf16.mxu0 %v3874_v49 }
 0x198   :  { %2490 = vmatpush2.bf16.msra.mxu0 %v3872_v50 }
 0x199   :  { %2491 = vmatprep.subr.bf16.mxu0 %v3880_v52 }
 0x19c   :  { %v1496_v56 = vpop.f32.mrf.mxu0  ;;  %2492 = vmatpush2.bf16.msra.mxu0 %v3878_v53 }
 0x19d   :  { %2493 = vmatprep.subr.bf16.mxu0 %v3886_v55  ;;  %v1497_v2 = vadd.f32 %v1496_v56, %v1453_v51 }
 0x19e   :  { %v1498_v59 = vpop.f32.mrf.mxu0 }
 0x19f   :  { %v1499_v5 = vadd.f32 %v1498_v59, %v1455_v44 }
 0x1a0   :  { %v1500_v61 = vpop.f32.mrf.mxu0  ;;  %2494 = vmatpush2.bf16.msra.mxu0 %v3884_v57 }
 0x1a1   :  { %2495 = vmatprep.subr.bf16.mxu0 %v3892_v60  ;;  %v1501_v11 = vadd.f32 %v1500_v61, %v1457_v58 }
 0x1a2   :  { %v1502_v0 = vpop.f32.mrf.mxu0 }
 0x1a3   :  { %v1503_v24 = vadd.f32 %v1502_v0, %v1459_v63 }
 0x1a4   :  { %v1582_v4 = vpop.f32.mrf.mxu0  ;;  %2496 = vmatpush2.bf16.msra.mxu0 %v3890_v62 }
 0x1a5   :  { %v1539_v3 = vpop.f32.mrf.mxu1  ;;  %2497 = vmatprep.subr.bf16.mxu0 %v3898_v1 }
 0x1a6   :  { %v1540_v6 = vadd.f32 %v1539_v3, %v1497_v2  ;;  %v1584_v9 = vpop.f32.mrf.mxu0  ;;  %v3923_v3 = vld [vmem:[#allocation4 + $0x2e8] ss:$16 sps:$4 sm:$0xff]  }
 0x1a7   :  { %v1541_v8 = vpop.f32.mrf.mxu1 }
 0x1a8   :  { %v1583_v14 = vadd.f32 %v1582_v4, %v1540_v6  ;;  %v1542_v15 = vadd.f32 %v1541_v8, %v1499_v5  ;;  %v1586_v17 = vpop.f32.mrf.mxu0  ;;  %2498 = vmatpush2.bf16.msra.mxu0 %v3896_v7  ;;  %v3928_v5 = vld [vmem:[#allocation4 + $0x2cc] ss:$16 sps:$4 sm:$0xff]   ;;  %v3929_v7 = vld [vmem:[#allocation4 + $0x2a8] ss:$16 sps:$4 sm:$0xff]  }
 0x1a9   :  { %v1543_v16 = vpop.f32.mrf.mxu1  ;;  %2499 = vmatprep.subr.bf16.mxu0 %v3904_v10  ;;  %v3931_v6 = vld [vmem:[#allocation4 + $0x2ac] ss:$16 sps:$4 sm:$0xff]  }
 0x1aa   :  { %v1593_v18 = vmax.f32 %v1583_v14, 0.0  ;;  %v1585_v19 = vadd.f32 %v1584_v9, %v1542_v15  ;;  %v1544_v20 = vadd.f32 %v1543_v16, %v1501_v11  ;;  %v1588_v30 = vpop.f32.mrf.mxu0  ;;  %v3934_v8 = vld [vmem:[#allocation4 + $0x28c] ss:$16 sps:$4 sm:$0xff]   ;;  %v3932_v9 = vld [vmem:[#allocation4 + $0x288] ss:$16 sps:$4 sm:$0xff]  }
 0x1ab   :  { %v1545_v25 = vpop.f32.mrf.mxu1  ;;  %v3937_v10 = vld [vmem:[#allocation4 + $0x26c] ss:$16 sps:$4 sm:$0xff]   ;;  %v3935_v11 = vld [vmem:[#allocation4 + $0x268] ss:$16 sps:$4 sm:$0xff]  }
 0x1ac   :  { %v3370_v28 = vcvt.f32.s32 %v1593_v18  ;;  %v1594_v29 = vmax.f32 %v1585_v19, 0.0  ;;  %v1587_v31 = vadd.f32 %v1586_v17, %v1544_v20  ;;  %v1546_v32 = vadd.f32 %v1545_v25, %v1503_v24  ;;  %2500 = vmatpush2.bf16.msra.mxu0 %v3902_v22  ;;  %v3940_v14 = vld [vmem:[#allocation4 + $0x24c] ss:$16 sps:$4 sm:$0xff]   ;;  %v3938_v15 = vld [vmem:[#allocation4 + $0x248] ss:$16 sps:$4 sm:$0xff]  }
 0x1ad   :  { %2501 = vmatprep.subr.bf16.mxu0 %v3910_v27  ;;  %v3368_v26 = vand.u32 2147483647, %v1593_v18  ;;  %v3373_v46 = vand.u32 2147483648, %v1593_v18  ;;  %v3943_v16 = vld [vmem:[#allocation4 + $0x22c] ss:$16 sps:$4 sm:$0xff]  }
 0x1ae   :  { %v3371_v33 = vcvt.s32.f32 %v3370_v28  ;;  %v3378_v34 = vcvt.f32.s32 %v1594_v29  ;;  %v1597_v36 = vmax.f32 %v1587_v31, 0.0  ;;  %v1589_v37 = vadd.f32 %v1588_v30, %v1546_v32  ;;  %v3941_v17 = vld [vmem:[#allocation4 + $0x228] ss:$16 sps:$4 sm:$0xff]   ;;  %v3949_v20 = vld [vmem:[#allocation4 + $0x3ec] ss:$16 sps:$4 sm:$0xff]  }
 0x1af   :  { %v3381_v23 = vand.u32 2147483648, %v1594_v29  ;;  %v3376_v12 = vand.u32 2147483647, %v1594_v29  ;;  %vm3369_vm7 = vcmp.lt.f32.partialorder %v3368_v26, 8388608.0  ;;  %v3944_v19 = vld [vmem:[#allocation4 + $0x208] ss:$16 sps:$4 sm:$0xff]  }
 0x1b0   :  { %v3379_v13 = vcvt.s32.f32 %v3378_v34  ;;  %v3402_v40 = vcvt.f32.s32 %v1597_v36  ;;  %v1598_v41 = vmax.f32 %v1589_v37, 0.0  ;;  %v3372_v21 = vand.u32 2147483647, %v3371_v33  ;;  %2502 = vmatpush2.bf16.msra.mxu0 %v3908_v35  ;;  %v3947_v22 = vld [vmem:[#allocation4 + $0x3e8] ss:$16 sps:$4 sm:$0xff]   ;;  %v3977_v26 = vld [vmem:[%s4267_s3 + $0x60] sm:$0xff]  }
 0x1b1   :  { %2503 = vmatprep.subr.bf16.mxu0 %v3916_v38  ;;  %v3400_v47 = vand.u32 2147483647, %v1597_v36  ;;  %v3405_v49 = vand.u32 2147483648, %v1597_v36  ;;  %vm3377_vm6 = vcmp.lt.f32.partialorder %v3376_v12, 8388608.0  ;;  %v3952_v24 = vld [vmem:[#allocation4 + $0x3cc] ss:$16 sps:$4 sm:$0xff]  }
 0x1b2   :  { %v3380_v42 = vand.u32 2147483647, %v3379_v13  ;;  %v3403_v45 = vcvt.s32.f32 %v3402_v40  ;;  %v3410_v54 = vcvt.f32.s32 %v1598_v41  ;;  %v3374_v52 = vor.u32 %v3373_v46, %v3372_v21  ;;  %v3950_v25 = vld [vmem:[#allocation4 + $0x3c8] ss:$16 sps:$4 sm:$0xff]   ;;  %v3955_v27 = vld [vmem:[#allocation4 + $0x3ac] ss:$16 sps:$4 sm:$0xff]  }
 0x1b3   :  { %v3408_v53 = vand.u32 2147483647, %v1598_v41  ;;  %v3413_v56 = vand.u32 2147483648, %v1598_v41  ;;  %vm3401_vm5 = vcmp.lt.f32.partialorder %v3400_v47, 8388608.0  ;;  %v3953_v28 = vld [vmem:[#allocation4 + $0x3a8] ss:$16 sps:$4 sm:$0xff]  }
 0x1b4   :  { %v3404_v48 = vand.u32 2147483647, %v3403_v45  ;;  %v3411_v50 = vcvt.s32.f32 %v3410_v54  ;;  %v3382_v51 = vor.u32 %v3381_v23, %v3380_v42  ;;  %2504 = vmatpush2.bf16.msra.mxu0 %v3914_v43  ;;  %v3375_v60 = vsel %vm3369_vm7, %v3374_v52, %v1593_v18  ;;  %v3946_v18 = vld [vmem:[#allocation4 + $0x20c] ss:$16 sps:$4 sm:$0xff]   ;;  %v3956_v30 = vld [vmem:[#allocation4 + $0x388] ss:$16 sps:$4 sm:$0xff]  }
 0x1b5   :  { %vm3409_vm8 = vcmp.lt.f32.partialorder %v3408_v53, 8388608.0  ;;  %v1609_v1 = vmin.f32 %v3375_v60, 255.0  ;;  %v3961_v31 = vld [vmem:[#allocation4 + $0x36c] ss:$16 sps:$4 sm:$0xff]   ;;  %v3959_v32 = vld [vmem:[#allocation4 + $0x368] ss:$16 sps:$4 sm:$0xff]  }
 0x1b6   :  { %v3406_v44 = vor.u32 %v3405_v49, %v3404_v48  ;;  %v3412_v55 = vand.u32 2147483647, %v3411_v50  ;;  %v3383_v58 = vsel %vm3377_vm6, %v3382_v51, %v1594_v29  ;;  %v3958_v29 = vld [vmem:[#allocation4 + $0x38c] ss:$16 sps:$4 sm:$0xff]   ;;  %v3962_v34 = vld [vmem:[#allocation4 + $0x348] ss:$16 sps:$4 sm:$0xff]  }
 0x1b7   :  { %2506 = vmatmul.mubr.bf16.vlgmr.msra.gmra.mxu0 %v4157_v39  ;;  %v1610_v63 = vmin.f32 %v3383_v58, 255.0  ;;  %v3926_v39 = vld [vmem:[#allocation4 + $0x2c8] ss:$16 sps:$4 sm:$0xff]   ;;  %v3964_v33 = vld [vmem:[#allocation4 + $0x34c] ss:$16 sps:$4 sm:$0xff]   ;;  %v3974_v21 = vld [vmem:[%s4267_s3 + $0x30] sm:$0xff]  }
 0x1b8   :  { %v3407_v57 = vsel %vm3401_vm5, %v3406_v44, %v1597_v36  ;;  %v3414_v59 = vor.u32 %v3413_v56, %v3412_v55  ;;  %v3967_v35 = vld [vmem:[#allocation4 + $0x32c] ss:$16 sps:$4 sm:$0xff]   ;;  %v3965_v36 = vld [vmem:[#allocation4 + $0x328] ss:$16 sps:$4 sm:$0xff]   ;;  %v3978_v23 = vld [vmem:[%s4267_s3 + $0x20] sm:$0xff]  }
 0x1b9   :  { %v1613_v61 = vmin.f32 %v3407_v57, 255.0  ;;  %v3970_v37 = vld [vmem:[#allocation4 + $0x30c] ss:$16 sps:$4 sm:$0xff]   ;;  %v3968_v13 = vld [vmem:[#allocation4 + $0x308] ss:$16 sps:$4 sm:$0xff]   ;;  %v3981_v46 = vld [vmem:[%s4267_s3 + $0x50] sm:$0xff]  }
 0x1ba   :  { %v3415_v62 = vsel %vm3409_vm8, %v3414_v59, %v1598_v41  ;;  %v3971_v38 = vld [vmem:[%s4267_s3 + $0x78] sm:$0xff]   ;;  %v3973_v41 = vld [vmem:[%s4267_s3 + $0x70] sm:$0xff]   ;;  %v3975_v42 = vld [vmem:[%s4267_s3 + $0x68] sm:$0xff]  }
 0x1bb   :  { %v1614_v0 = vmin.f32 %v3415_v62, 255.0  ;;  %v4161_v4 = vpack.c.bf16 %v1613_v61, %v1609_v1  ;;  %v3972_v40 = vld [vmem:[%s4267_s3 + $0x38] sm:$0xff]   ;;  %3308 = vmatprep.subr.bf16.mxu0 %v3971_v38  ;;  %v3976_v43 = vld [vmem:[%s4267_s3 + $0x28] sm:$0xff]   ;;  %v3982_v47 = vld [vmem:[%s4267_s3 + $0x10] sm:$0xff]  }
 0x1bc   :  { %3309 = vmatpush3.bf16.msra.mxu0 %v3972_v40  ;;  %v3979_v45 = vld [vmem:[%s4267_s3 + $0x58] sm:$0xff]   ;;  %v3983_v12 = vld [vmem:[%s4267_s3 + $0x48] sm:$0xff]   ;;  %v3985_v49 = vld [vmem:[%s4267_s3 + $0x40] sm:$0xff]  }
 0x1bd   :  { %v1618_v2 = vpack.c.bf16 %v1614_v0, %v1610_v63  ;;  %3310 = vmatprep.subr.bf16.mxu0 %v3973_v41  ;;  %v3980_v54 = vld [vmem:[%s4267_s3 + $0x18] sm:$0xff]   ;;  %v3984_v48 = vld [vmem:[%s4267_s3 + $0x8] sm:$0xff]   ;;  %v3986_v50 = vld [vmem:[%s4267_s3] sm:$0xff]  }
 0x1be   :  { %v3987_v51 = vld [vmem:[%s4267_s3 + $0xf8] sm:$0xff]   ;;  %v3989_v53 = vld [vmem:[%s4267_s3 + $0xf0] sm:$0xff]   ;;  %v3991_v55 = vld [vmem:[%s4267_s3 + $0xe8] sm:$0xff]  }
 0x1bf   :  { %2462 = vmatprep.mubr.bf16.mxu1 %v1618_v2  ;;  %v3988_v52 = vld [vmem:[%s4267_s3 + $0xb8] sm:$0xff]   ;;  %v3990_v44 = vld [vmem:[%s4267_s3 + $0xb0] sm:$0xff]   ;;  %v3992_v56 = vld [vmem:[%s4267_s3 + $0xa8] sm:$0xff]  }
 0x1c0   :  { %2463 = vmatmul.mubr.bf16.vlgmr.msra.gmra.mxu1 %v4161_v4  ;;  %3311 = vmatpush3.bf16.msra.mxu0 %v3974_v21  ;;  %v3993_v57 = vld [vmem:[%s4267_s3 + $0xe0] sm:$0xff]   ;;  %v3995_v59 = vld [vmem:[%s4267_s3 + $0xd8] sm:$0xff]   ;;  %v3997_v61 = vld [vmem:[%s4267_s3 + $0xd0] sm:$0xff]  }
 0x1c1   :  { %2517 = vmatpush1.bf16.msra.mxu1 %v3923_v3  ;;  %2548 = vmatprep.mubr.bf16.mxu1 %v1618_v2  ;;  %v3994_v58 = vld [vmem:[%s4267_s3 + $0xa0] sm:$0xff]   ;;  %v3996_v60 = vld [vmem:[%s4267_s3 + $0x98] sm:$0xff]   ;;  %v3998_v62 = vld [vmem:[%s4267_s3 + $0x90] sm:$0xff]  }
 0x1c2   :  { %2518 = vmatprep.subr.bf16.mxu1 %v3928_v5  ;;  %3312 = vmatprep.subr.bf16.mxu0 %v3975_v42  ;;  %v3999_v63 = vld [vmem:[%s4267_s3 + $0xc8] sm:$0xff]   ;;  %v4001_v1 = vld [vmem:[%s4267_s3 + $0xc0] sm:$0xff]  }
 0x1c3   :  { %v4000_v0 = vld [vmem:[%s4267_s3 + $0x88] sm:$0xff]   ;;  %v4002_v2 = vld [vmem:[%s4267_s3 + $0x80] sm:$0xff]  }
 0x1c4   :  { %3313 = vmatpush3.bf16.msra.mxu0 %v3976_v43 }
 0x1c5   :  { %2519 = vmatpush1.bf16.msra.mxu1 %v3926_v39  ;;  %3314 = vmatprep.subr.bf16.mxu0 %v3977_v26 }
 0x1c6   :  { %2520 = vmatprep.subr.bf16.mxu1 %v3931_v6 }
 0x1c8   :  { %3315 = vmatpush3.bf16.msra.mxu0 %v3978_v23 }
 0x1c9   :  { %2521 = vmatpush1.bf16.msra.mxu1 %v3929_v7  ;;  %3316 = vmatprep.subr.bf16.mxu0 %v3979_v45 }
 0x1ca   :  { %2522 = vmatprep.subr.bf16.mxu1 %v3934_v8 }
 0x1cc   :  { %3317 = vmatpush3.bf16.msra.mxu0 %v3980_v54 }
 0x1cd   :  { %2523 = vmatpush1.bf16.msra.mxu1 %v3932_v9  ;;  %3318 = vmatprep.subr.bf16.mxu0 %v3981_v46 }
 0x1ce   :  { %2524 = vmatprep.subr.bf16.mxu1 %v3937_v10 }
 0x1d0   :  { %3319 = vmatpush3.bf16.msra.mxu0 %v3982_v47 }
 0x1d1   :  { %2525 = vmatpush1.bf16.msra.mxu1 %v3935_v11  ;;  %3320 = vmatprep.subr.bf16.mxu0 %v3983_v12 }
 0x1d2   :  { %2526 = vmatprep.subr.bf16.mxu1 %v3940_v14 }
 0x1d4   :  { %3321 = vmatpush3.bf16.msra.mxu0 %v3984_v48 }
 0x1d5   :  { %2527 = vmatpush1.bf16.msra.mxu1 %v3938_v15  ;;  %3322 = vmatprep.subr.bf16.mxu0 %v3985_v49 }
 0x1d6   :  { %2528 = vmatprep.subr.bf16.mxu1 %v3943_v16 }
 0x1d8   :  { %3323 = vmatpush3.bf16.msra.mxu0 %v3986_v50 }
 0x1d9   :  { %2529 = vmatpush1.bf16.msra.mxu1 %v3941_v17 }
 0x1da   :  { %2530 = vmatprep.subr.bf16.mxu1 %v3946_v18 }
 0x1dd   :  { %2531 = vmatpush1.bf16.msra.mxu1 %v3944_v19 }
 0x1de   :  { %2532 = vmatprep.subr.bf16.mxu1 %v3949_v20 }
 0x1e1   :  { %2533 = vmatpush2.bf16.msra.mxu1 %v3947_v22 }
 0x1e2   :  { %2534 = vmatprep.subr.bf16.mxu1 %v3952_v24 }
 0x1e5   :  { %2535 = vmatpush2.bf16.msra.mxu1 %v3950_v25 }
 0x1e6   :  { %2536 = vmatprep.subr.bf16.mxu1 %v3955_v27 }
 0x1e9   :  { %2537 = vmatpush2.bf16.msra.mxu1 %v3953_v28 }
 0x1ea   :  { %2538 = vmatprep.subr.bf16.mxu1 %v3958_v29 }
 0x1ed   :  { %2539 = vmatpush2.bf16.msra.mxu1 %v3956_v30 }
 0x1ee   :  { %2540 = vmatprep.subr.bf16.mxu1 %v3961_v31 }
 0x1f1   :  { %2541 = vmatpush2.bf16.msra.mxu1 %v3959_v32 }
 0x1f2   :  { %2542 = vmatprep.subr.bf16.mxu1 %v3964_v33 }
 0x1f5   :  { %2543 = vmatpush2.bf16.msra.mxu1 %v3962_v34 }
 0x1f6   :  { %2544 = vmatprep.subr.bf16.mxu1 %v3967_v35 }
 0x1f9   :  { %2545 = vmatpush2.bf16.msra.mxu1 %v3965_v36 }
 0x1fa   :  { %2546 = vmatprep.subr.bf16.mxu1 %v3970_v37 }
 0x1fd   :  { %2547 = vmatpush2.bf16.msra.mxu1 %v3968_v13 }
 0x1fe   :  { %3330 = vmatprep.subr.bf16.mxu1 %v3987_v51 }
 0x200   :  { %2549 = vmatmul.mubr.bf16.vlgmr.msra.gmra.mxu1 %v4161_v4 }
 0x201   :  { %3331 = vmatpush3.bf16.msra.mxu1 %v3988_v52 }
 0x202   :  { %3332 = vmatprep.subr.bf16.mxu1 %v3989_v53 }
 0x205   :  { %3333 = vmatpush3.bf16.msra.mxu1 %v3990_v44 }
 0x206   :  { %3334 = vmatprep.subr.bf16.mxu1 %v3991_v55 }
 0x209   :  { %3335 = vmatpush3.bf16.msra.mxu1 %v3992_v56 }
 0x20a   :  { %3336 = vmatprep.subr.bf16.mxu1 %v3993_v57 }
 0x20d   :  { %3337 = vmatpush3.bf16.msra.mxu1 %v3994_v58 }
 0x20e   :  { %3338 = vmatprep.subr.bf16.mxu1 %v3995_v59 }
 0x211   :  { %3339 = vmatpush3.bf16.msra.mxu1 %v3996_v60 }
 0x212   :  { %3340 = vmatprep.subr.bf16.mxu1 %v3997_v61 }
 0x215   :  { %3341 = vmatpush3.bf16.msra.mxu1 %v3998_v62 }
 0x216   :  { %3342 = vmatprep.subr.bf16.mxu1 %v3999_v63 }
 0x219   :  { %3343 = vmatpush3.bf16.msra.mxu1 %v4000_v0 }
 0x21a   :  { %3344 = vmatprep.subr.bf16.mxu1 %v4001_v1 }
 0x21d   :  { %3345 = vmatpush3.bf16.msra.mxu1 %v4002_v2 }
 0x237   :  { %v2421_v3 = vpop.f32.mrf.mxu0 }
 0x239   :  { %v2423_v4 = vpop.f32.mrf.mxu0 }
 0x23b   :  { %v2425_v7 = vpop.f32.mrf.mxu0 }
 0x23d   :  { %v2427_v17 = vpop.f32.mrf.mxu0 }
 0x277   :  { %v2507_v53 = vpop.f32.mrf.mxu0 }
 0x279   :  { %v2509_v44 = vpop.f32.mrf.mxu0 }
 0x27b   :  { %v2511_v58 = vpop.f32.mrf.mxu0 }
 0x27d   :  { %v2513_v2 = vpop.f32.mrf.mxu0 }
 0x280   :  { %v2464_v5 = vpop.f32.mrf.mxu1 }
 0x281   :  { %v2465_v39 = vadd.f32 %v2464_v5, %v2421_v3 }
 0x282   :  { %v2466_v6 = vpop.f32.mrf.mxu1 }
 0x283   :  { %v2559_v8 = vmax.f32 %v2465_v39, 0.0  ;;  %v2467_v9 = vadd.f32 %v2466_v6, %v2423_v4 }
 0x284   :  { %v2468_v10 = vpop.f32.mrf.mxu1 }
 0x285   :  { %v3418_v11 = vcvt.f32.s32 %v2559_v8  ;;  %v2560_v14 = vmax.f32 %v2467_v9, 0.0  ;;  %v2469_v15 = vadd.f32 %v2468_v10, %v2425_v7  ;;  %v3416_v30 = vand.u32 2147483647, %v2559_v8 }
 0x286   :  { %v2470_v16 = vpop.f32.mrf.mxu1  ;;  %v3421_v34 = vand.u32 2147483648, %v2559_v8 }
 0x287   :  { %v3419_v18 = vcvt.s32.f32 %v3418_v11  ;;  %v3426_v19 = vcvt.f32.s32 %v2560_v14  ;;  %v2563_v20 = vmax.f32 %v2469_v15, 0.0  ;;  %v2471_v22 = vadd.f32 %v2470_v16, %v2427_v17 }
 0x288   :  { %v3429_v31 = vand.u32 2147483648, %v2560_v14  ;;  %v3424_v36 = vand.u32 2147483647, %v2560_v14  ;;  %vm3417_vm11 = vcmp.lt.f32.partialorder %v3416_v30, 8388608.0 }
 0x289   :  { %v3427_v24 = vcvt.s32.f32 %v3426_v19  ;;  %v3450_v25 = vcvt.f32.s32 %v2563_v20  ;;  %v2564_v27 = vmax.f32 %v2471_v22, 0.0  ;;  %v3420_v28 = vand.u32 2147483647, %v3419_v18 }
 0x28a   :  { %v3448_v35 = vand.u32 2147483647, %v2563_v20  ;;  %v3453_v38 = vand.u32 2147483648, %v2563_v20  ;;  %vm3425_vm10 = vcmp.lt.f32.partialorder %v3424_v36, 8388608.0 }
 0x28b   :  { %v3428_v29 = vand.u32 2147483647, %v3427_v24  ;;  %v3451_v32 = vcvt.s32.f32 %v3450_v25  ;;  %v3458_v33 = vcvt.f32.s32 %v2564_v27  ;;  %v3422_v41 = vor.u32 %v3421_v34, %v3420_v28 }
 0x28c   :  { %v3456_v21 = vand.u32 2147483647, %v2564_v27  ;;  %v3461_v26 = vand.u32 2147483648, %v2564_v27  ;;  %vm3449_vm9 = vcmp.lt.f32.partialorder %v3448_v35, 8388608.0 }
 0x28d   :  { %v3452_v37 = vand.u32 2147483647, %v3451_v32  ;;  %v3459_v13 = vcvt.s32.f32 %v3458_v33  ;;  %v3430_v40 = vor.u32 %v3429_v31, %v3428_v29  ;;  %v3423_v46 = vsel %vm3417_vm11, %v3422_v41, %v2559_v8 }
 0x28e   :  { %vm3457_vm12 = vcmp.lt.f32.partialorder %v3456_v21, 8388608.0  ;;  %v2575_v50 = vmin.f32 %v3423_v46, 255.0 }
 0x28f   :  { %v3454_v42 = vor.u32 %v3453_v38, %v3452_v37  ;;  %v3460_v43 = vand.u32 2147483647, %v3459_v13  ;;  %v3431_v45 = vsel %vm3425_vm10, %v3430_v40, %v2560_v14 }
 0x290   :  { %v2576_v48 = vmin.f32 %v3431_v45, 255.0 }
 0x291   :  { %v3455_v23 = vsel %vm3449_vm9, %v3454_v42, %v2563_v20  ;;  %v3462_v54 = vor.u32 %v3461_v26, %v3460_v43 }
 0x292   :  { %v2579_v47 = vmin.f32 %v3455_v23, 255.0 }
 0x293   :  { %v3463_v12 = vsel %vm3457_vm12, %v3462_v54, %v2564_v27 }
 0x294   :  { %v2580_v49 = vmin.f32 %v3463_v12, 255.0  ;;  %v2583_v52 = vpack.c.bf16 %v2579_v47, %v2575_v50 }
 0x296   :  { %v2584_v51 = vpack.c.bf16 %v2580_v49, %v2576_v48 }
 0x298   :  { %2875 = vmatprep.mubr.bf16.mxu0 %v2584_v51 }
 0x299   :  { %2876 = vmatmul.mubr.bf16.vlgmr.msra.gmra.mxu0 %v2583_v52 }
 0x2c0   :  { %v2550_v55 = vpop.f32.mrf.mxu1 }
 0x2c1   :  { %v2551_v56 = vadd.f32 %v2550_v55, %v2507_v53 }
 0x2c2   :  { %v2552_v57 = vpop.f32.mrf.mxu1 }
 0x2c3   :  { %v2561_v59 = vmax.f32 %v2551_v56, 0.0  ;;  %v2553_v60 = vadd.f32 %v2552_v57, %v2509_v44 }
 0x2c4   :  { %v2554_v61 = vpop.f32.mrf.mxu1 }
 0x2c5   :  { %v3434_v62 = vcvt.f32.s32 %v2561_v59  ;;  %v2562_v63 = vmax.f32 %v2553_v60, 0.0  ;;  %v2555_v0 = vadd.f32 %v2554_v61, %v2511_v58  ;;  %v3432_v11 = vand.u32 2147483647, %v2561_v59 }
 0x2c6   :  { %v2556_v1 = vpop.f32.mrf.mxu1  ;;  %v3437_v17 = vand.u32 2147483648, %v2561_v59 }
 0x2c7   :  { %v3435_v3 = vcvt.s32.f32 %v3434_v62  ;;  %v3442_v4 = vcvt.f32.s32 %v2562_v63  ;;  %v2565_v5 = vmax.f32 %v2555_v0, 0.0  ;;  %v2557_v39 = vadd.f32 %v2556_v1, %v2513_v2 }
 0x2c8   :  { %v3445_v14 = vand.u32 2147483648, %v2562_v63  ;;  %v3440_v19 = vand.u32 2147483647, %v2562_v63  ;;  %vm3433_vm15 = vcmp.lt.f32.partialorder %v3432_v11, 8388608.0 }
 0x2c9   :  { %v3443_v6 = vcvt.s32.f32 %v3442_v4  ;;  %v3466_v7 = vcvt.f32.s32 %v2565_v5  ;;  %v2566_v8 = vmax.f32 %v2557_v39, 0.0  ;;  %v3436_v9 = vand.u32 2147483647, %v3435_v3 }
 0x2ca   :  { %v3464_v18 = vand.u32 2147483647, %v2565_v5  ;;  %v3469_v22 = vand.u32 2147483648, %v2565_v5  ;;  %vm3441_vm14 = vcmp.lt.f32.partialorder %v3440_v19, 8388608.0 }
 0x2cb   :  { %v3444_v10 = vand.u32 2147483647, %v3443_v6  ;;  %v3467_v15 = vcvt.s32.f32 %v3466_v7  ;;  %v3474_v16 = vcvt.f32.s32 %v2566_v8  ;;  %v3438_v27 = vor.u32 %v3437_v17, %v3436_v9 }
 0x2cc   :  { %v3472_v28 = vand.u32 2147483647, %v2566_v8  ;;  %v3477_v31 = vand.u32 2147483648, %v2566_v8  ;;  %vm3465_vm13 = vcmp.lt.f32.partialorder %v3464_v18, 8388608.0 }
 0x2cd   :  { %v3468_v20 = vand.u32 2147483647, %v3467_v15  ;;  %v3475_v24 = vcvt.s32.f32 %v3474_v16  ;;  %v3446_v25 = vor.u32 %v3445_v14, %v3444_v10  ;;  %v3439_v35 = vsel %vm3433_vm15, %v3438_v27, %v2561_v59 }
 0x2ce   :  { %vm3473_vm0 = vcmp.lt.f32.partialorder %v3472_v28, 8388608.0  ;;  %v2577_v40 = vmin.f32 %v3439_v35, 255.0 }
 0x2cf   :  { %v3470_v29 = vor.u32 %v3469_v22, %v3468_v20  ;;  %v3476_v30 = vand.u32 2147483647, %v3475_v24  ;;  %v3447_v33 = vsel %vm3441_vm14, %v3446_v25, %v2562_v63 }
 0x2d0   :  { %v2578_v38 = vmin.f32 %v3447_v33, 255.0 }
 0x2d1   :  { %v3471_v32 = vsel %vm3465_vm13, %v3470_v29, %v2565_v5  ;;  %v3478_v34 = vor.u32 %v3477_v31, %v3476_v30 }
 0x2d2   :  { %v2581_v36 = vmin.f32 %v3471_v32, 255.0 }
 0x2d3   :  { %v3479_v37 = vsel %vm3473_vm0, %v3478_v34, %v2566_v8 }
 0x2d4   :  { %v2582_v13 = vmin.f32 %v3479_v37, 255.0  ;;  %v2585_v21 = vpack.c.bf16 %v2581_v36, %v2577_v40 }
 0x2d6   :  { %v2586_v41 = vpack.c.bf16 %v2582_v13, %v2578_v38 }
 0x2d8   :  { %2916 = vmatprep.mubr.bf16.mxu1 %v2586_v41 }
 0x2d9   :  { %2917 = vmatmul.mubr.bf16.vlgmr.msra.gmra.mxu1 %v2585_v21 }
 0x359   :  { %v3324_v42 = vpop.f32.mrf.mxu0 }
 0x35b   :  { %v3325_v43 = vpop.f32.mrf.mxu0 }
 0x35c   :  { %v3326_v48 = vadd.f32 %v3325_v43, %v3324_v42 }
 0x35d   :  { %v3327_v26 = vpop.f32.mrf.mxu0 }
 0x35f   :  { %v3328_v54 = vpop.f32.mrf.mxu0 }
 0x360   :  { %v3329_v49 = vadd.f32 %v3328_v54, %v3327_v26 }
 0x399   :  { %v3346_v23 = vpop.f32.mrf.mxu1 }
 0x39b   :  { %v3347_v45 = vpop.f32.mrf.mxu1 }
 0x39c   :  { %v3348_v47 = vadd.f32 %v3347_v45, %v3346_v23 }
 0x39d   :  { %v3349_v46 = vpop.f32.mrf.mxu1 }
 0x39e   :  { %v2919_v51 = vadd.f32 %v3348_v47, %v3326_v48 }
 0x39f   :  { %v3350_v12 = vpop.f32.mrf.mxu1 }
 0x3a0   :  { %v3351_v50 = vadd.f32 %v3350_v12, %v3349_v46 }
 0x3a2   :  { %v2922_v52 = vadd.f32 %v3351_v50, %v3329_v49 }
 0x3a4   :  { %v3306_v53 = vpack.c.bf16 %v2922_v52, %v2919_v51 }
 0x3a6   :  { %3307 = vst [vmem:[%s4268_s4] sm:$0xff] %v3306_v53  }
 0x3a7   :  { %2939 = vsyncpa [#allocation3], 1 }
 0x3a8   :  { %2940 = vsyncpa [#allocation5], 1 }

</bundles_post_ra>
